<compile_context>
chip_gen: v7x
topology: tpu7x:2x2x1
jax: 0.10.0
libtpu: 0.0.40
codegen_flags: <defaults>
</compile_context>

<pallas_src>
import jax
import jax.numpy as jnp
import numpy as np
from jax import lax
from jax.experimental import pallas as pl
from jax.experimental.pallas import tpu as pltpu

# ---- "cfg" constants (small synthetic sizes) ----
EMBEDDING_DIM = 32
LSTM_HIDDEN_SIZE = 32
LSTM_OUT_SIZE = 32
CATEGORIES = 5
LM_HIDDEN_SIZE = 32
LM_MAX_VOCAB_SIZE = 50
VOCAB_SIZE = 20
SEQ_LEN = 8
LM_OUT_SIZE = min(VOCAB_SIZE + 1, LM_MAX_VOCAB_SIZE)    # 21

H = LSTM_HIDDEN_SIZE
E = EMBEDDING_DIM
S = SEQ_LEN
GW = 8 * H                                  # 256: fused gate width (both dirs)
V_PAD = ((VOCAB_SIZE + 7) // 8) * 8         # 24 (sublane-padded vocab)
BB = 8                                      # sequences per grid step (8 sublanes)
SLAB_LANES = 128
OUT_ROWS = (2 * S - 1) * BB                 # 56 LM rows + 64 final rows = 120

# weight-slab row offsets (all blocks are 8-row aligned, 256 lanes wide, bf16)
R_PROJ = 0                                  # (2*V_PAD, GW)  embed x input-proj
R_WHH = R_PROJ + 2 * V_PAD                  # (2H, GW)       recurrent weights
R_LM1 = R_WHH + 2 * H                       # (2H, 2*LMH)    fused LM layer 1
R_LM2 = R_LM1 + 2 * H                       # (2*LMH, 128)   fused LM layer 2
R_LL = R_LM2 + 2 * LM_HIDDEN_SIZE           # (2H, 32)       lstm_linear
R_FIN = R_LL + 2 * H                        # (32, 128)      final linear
W_ROWS = R_FIN + LSTM_OUT_SIZE              # 336

assert 2 * LM_OUT_SIZE <= SLAB_LANES and CATEGORIES <= SLAB_LANES


def seqnet_kernel(idx_ref, w_ref, b_ref, out_ref):
    f32 = jnp.float32
    bf16 = jnp.bfloat16

    # ---- one-hot gather + hoisted input projection (single small matmul) ----
    ids = idx_ref[0]                                            # (S*BB, 2) i32
    iota = lax.broadcasted_iota(jnp.int32, (S * BB, 2 * V_PAD), 1)
    hot = jnp.logical_or(iota == ids[:, 0:1], iota == ids[:, 1:2])
    onehot = jnp.where(hot, 1.0, 0.0).astype(bf16)              # (S*BB, 2*V_PAD)

    proj = w_ref[R_PROJ:R_PROJ + 2 * V_PAD, :]                  # (2*V_PAD, GW) bf16
    # row t*BB+b of xw = [x[b,t] proj fwd gates | x[b,S-1-t] proj bwd gates] + bias
    xw = jnp.dot(onehot, proj, preferred_element_type=f32) + b_ref[0:1, :]

    whh = w_ref[R_WHH:R_WHH + 2 * H, :]                         # (2H, GW) bf16

    # ---- fully unrolled bidirectional recurrence, BB sequences per step ----
    h = jnp.zeros((BB, 2 * H), f32)                             # [h_f | h_b]
    c = jnp.zeros((BB, 2 * H), f32)                             # [c_f | c_b]
    h_steps = []
    for t in range(S):
        gates = xw[t * BB:(t + 1) * BB, :] + jnp.dot(
            h.astype(bf16), whh, preferred_element_type=f32)    # (BB, GW)
        # permuted gate layout: [i_f|i_b | f_f|f_b | o_f|o_b | g_f|g_b]
        sig = jax.nn.sigmoid(gates[:, :6 * H])                  # one wide sigmoid
        g = jnp.tanh(gates[:, 6 * H:])                          # (BB, 2H)
        i_g = sig[:, 0:2 * H]
        f_g = sig[:, 2 * H:4 * H]
        o_g = sig[:, 4 * H:6 * H]
        c = f_g * c + i_g * g
        h = o_g * jnp.tanh(c)
        h_steps.append(h)       # [:, :H] = fwd hidden @ time t ; [:, H:] = bwd @ S-1-t

    # ---- fused LM heads: inputs [h_f(t) | h_b(t+1)] for t = 0..S-2 ----
    lm_in = jnp.concatenate(
        [jnp.concatenate([h_steps[t][:, :H], h_steps[S - 2 - t][:, H:]], axis=1)
         for t in range(S - 1)], axis=0)                        # ((S-1)*BB, 2H)
    lm_w1 = w_ref[R_LM1:R_LM1 + 2 * H, 0:2 * LM_HIDDEN_SIZE]
    lm_h = jnp.maximum(
        jnp.dot(lm_in.astype(bf16), lm_w1, preferred_element_type=f32)
        + b_ref[1:2, 0:2 * LM_HIDDEN_SIZE], 0.0)
    lm_w2 = w_ref[R_LM2:R_LM2 + 2 * LM_HIDDEN_SIZE, 0:SLAB_LANES]
    lm_out = (jnp.dot(lm_h.astype(bf16), lm_w2, preferred_element_type=f32)
              + b_ref[2:3, 0:SLAB_LANES])                       # ((S-1)*BB, 128)

    # ---- lstm_linear -> sigmoid -> final linear (isCrossEnt: no log_softmax) ----
    lstm_cat = jnp.concatenate(
        [jnp.concatenate([h_steps[t][:, :H], h_steps[S - 1 - t][:, H:]], axis=1)
         for t in range(S)], axis=0)                            # (S*BB, 2H)
    ll_w = w_ref[R_LL:R_LL + 2 * H, 0:LSTM_OUT_SIZE]
    ll = jax.nn.sigmoid(
        jnp.dot(lstm_cat.astype(bf16), ll_w, preferred_element_type=f32)
        + b_ref[3:4, 0:LSTM_OUT_SIZE])
    fin_w = w_ref[R_FIN:R_FIN + LSTM_OUT_SIZE, 0:SLAB_LANES]
    final = (jnp.dot(ll.astype(bf16), fin_w, preferred_element_type=f32)
             + b_ref[4:5, 0:SLAB_LANES])                        # (S*BB, 128)

    # ---- one lane-dense (120, 128) store per grid step ----
    out_ref[0] = jnp.concatenate([lm_out, final], axis=0)


# ---------------------------------------------------------------------------
# parameter init (PyTorch layouts) and one-time repacking
# ---------------------------------------------------------------------------
def init_params(key):
    def u(k, shape, lo=-0.1, hi=0.1):
        return jax.random.uniform(k, shape, jnp.float32, lo, hi)

    ks = jax.random.split(key, 24)
    p = {}
    p["emb_mat"] = u(ks[0], (VOCAB_SIZE, E))
    # BiLSTM (PyTorch layout: weight_ih (4H, in), weight_hh (4H, H), biases (4H,))
    p["w_ih_f"] = u(ks[1], (4 * H, E));  p["w_hh_f"] = u(ks[2], (4 * H, H))
    p["b_ih_f"] = u(ks[3], (4 * H,));    p["b_hh_f"] = u(ks[4], (4 * H,))
    p["w_ih_b"] = u(ks[5], (4 * H, E));  p["w_hh_b"] = u(ks[6], (4 * H, H))
    p["b_ih_b"] = u(ks[7], (4 * H,));    p["b_hh_b"] = u(ks[8], (4 * H,))
    # LM heads (LMnet approximated as 2-layer MLP)
    p["lmf_w1"] = u(ks[9], (LM_HIDDEN_SIZE, H));   p["lmf_b1"] = u(ks[10], (LM_HIDDEN_SIZE,))
    p["lmf_w2"] = u(ks[11], (LM_OUT_SIZE, LM_HIDDEN_SIZE)); p["lmf_b2"] = u(ks[12], (LM_OUT_SIZE,))
    p["lmb_w1"] = u(ks[13], (LM_HIDDEN_SIZE, H));  p["lmb_b1"] = u(ks[14], (LM_HIDDEN_SIZE,))
    p["lmb_w2"] = u(ks[15], (LM_OUT_SIZE, LM_HIDDEN_SIZE)); p["lmb_b2"] = u(ks[16], (LM_OUT_SIZE,))
    # lstm_linear: Linear(2H, LSTM_OUT_SIZE), linear: Linear(LSTM_OUT_SIZE, CATEGORIES)
    p["ll_w"] = u(ks[17], (LSTM_OUT_SIZE, 2 * H)); p["ll_b"] = u(ks[18], (LSTM_OUT_SIZE,))
    p["fin_w"] = u(ks[19], (CATEGORIES, LSTM_OUT_SIZE)); p["fin_b"] = u(ks[20], (CATEGORIES,))
    return p


def _block_diag2(a, b):
    top = jnp.concatenate([a, jnp.zeros((a.shape[0], b.shape[1]), a.dtype)], axis=1)
    bot = jnp.concatenate([jnp.zeros((b.shape[0], a.shape[1]), a.dtype), b], axis=1)
    return jnp.concatenate([top, bot], axis=0)


def _pad_cols(a, width):
    return jnp.pad(a, ((0, 0), (0, width - a.shape[1])))


def prepare_params(p):
    """One-time repacking: transpose to [in,out], merge biases, block-diag-fuse the
    two LSTM directions / LM heads, permute gate columns (sigmoid group first,
    tanh group last), pre-multiply the embedding into the input projection, and
    pack everything into one bf16 weight slab + one f32 bias slab."""
    t = lambda w: jnp.transpose(w).astype(jnp.float32)
    row = lambda b: b.reshape(1, -1).astype(jnp.float32)

    # column permutation of the fused 8H gate space:
    # old blocks [i_f f_f g_f o_f | i_b f_b g_b o_b] -> [i_f i_b f_f f_b o_f o_b g_f g_b]
    perm = np.concatenate([np.arange(H) + blk * H for blk in (0, 4, 1, 5, 3, 7, 2, 6)])

    wih_bd = _block_diag2(t(p["w_ih_f"]), t(p["w_ih_b"]))[:, perm]      # (2E, GW)
    whh_bd = _block_diag2(t(p["w_hh_f"]), t(p["w_hh_b"]))[:, perm]      # (2H, GW)
    b_bd = jnp.concatenate([row(p["b_ih_f"] + p["b_hh_f"]),
                            row(p["b_ih_b"] + p["b_hh_b"])], axis=1)[:, perm]  # (1, GW)

    emb = jnp.pad(p["emb_mat"].astype(jnp.float32), ((0, V_PAD - VOCAB_SIZE), (0, 0)))
    emb_bd = _block_diag2(emb, emb)                                     # (2*V_PAD, 2E)
    proj_tab = emb_bd @ wih_bd                                          # (2*V_PAD, GW)

    lm_w1 = _block_diag2(t(p["lmf_w1"]), t(p["lmb_w1"]))                # (2H, 2LMH)
    lm_b1 = jnp.concatenate([row(p["lmf_b1"]), row(p["lmb_b1"])], axis=1)
    lm_w2 = _block_diag2(t(p["lmf_w2"]), t(p["lmb_w2"]))                # (2LMH, 2Vlm)
    lm_b2 = jnp.concatenate([row(p["lmf_b2"]), row(p["lmb_b2"])], axis=1)
    ll_w = t(p["ll_w"]);  ll_b = row(p["ll_b"])
    fin_w = t(p["fin_w"]); fin_b = row(p["fin_b"])

    w_slab = jnp.concatenate([
        _pad_cols(proj_tab, GW),
        _pad_cols(whh_bd, GW),
        _pad_cols(lm_w1, GW),
        _pad_cols(lm_w2, GW),
        _pad_cols(ll_w, GW),
        _pad_cols(fin_w, GW),
    ], axis=0).astype(jnp.bfloat16)                                     # (W_ROWS, GW)
    assert w_slab.shape == (W_ROWS, GW)

    b_slab = jnp.concatenate([
        _pad_cols(b_bd, GW),
        _pad_cols(lm_b1, GW),
        _pad_cols(lm_b2, GW),
        _pad_cols(ll_b, GW),
        _pad_cols(fin_b, GW),
        jnp.zeros((3, GW), jnp.float32),
    ], axis=0)                                                          # (8, GW) f32

    return {"w_slab": w_slab, "b_slab": b_slab}


# ---------------------------------------------------------------------------
# batched forward
# ---------------------------------------------------------------------------
@jax.jit
def seqnet_forward(prep, sent_idx_seq, char_idx_seq=None, pos=None,
                   rel=None, dep_word=None):
    """sent_idx_seq: (B, S) int token ids.  Returns
    lm_f (B, S-1, V_lm), lm_b (B, S-1, V_lm), out (B, S, CATEGORIES)."""
    sent = sent_idx_seq.astype(jnp.int32)
    B = sent.shape[0]
    pad = (-B) % BB
    if pad:
        sent = jnp.concatenate([sent, jnp.zeros((pad, S), jnp.int32)], axis=0)
    Bp = B + pad
    NB = Bp // BB

    # per-sequence forward and reversed (offset) indices, t-major / b-minor per block
    fwd = sent                                      # idx[b, t]
    bwd = sent[:, ::-1] + V_PAD                     # idx[b, S-1-t] + V_PAD
    ids = jnp.stack([fwd, bwd], axis=-1)            # (Bp, S, 2)
    ids = (ids.reshape(NB, BB, S, 2).transpose(0, 2, 1, 3)
              .reshape(NB, S * BB, 2))

    slab = pl.pallas_call(
        seqnet_kernel,
        out_shape=jax.ShapeDtypeStruct((NB, OUT_ROWS, SLAB_LANES), jnp.float32),
        grid=(NB,),
        in_specs=[
            pl.BlockSpec((1, S * BB, 2), lambda nb: (nb, 0, 0)),
            pl.BlockSpec((W_ROWS, GW), lambda nb: (0, 0)),   # VMEM-resident weights
            pl.BlockSpec((8, GW), lambda nb: (0, 0)),        # VMEM-resident biases
        ],
        out_specs=pl.BlockSpec((1, OUT_ROWS, SLAB_LANES), lambda nb: (nb, 0, 0)),
        compiler_params=pltpu.CompilerParams(dimension_semantics=("parallel",)),
    )(ids, prep["w_slab"], prep["b_slab"])

    # unpack the lane-dense slab back to per-sequence outputs
    lm = (slab[:, :(S - 1) * BB, :]
          .reshape(NB, S - 1, BB, SLAB_LANES).transpose(0, 2, 1, 3)
          .reshape(Bp, S - 1, SLAB_LANES))
    fin = (slab[:, (S - 1) * BB:, :]
           .reshape(NB, S, BB, SLAB_LANES).transpose(0, 2, 1, 3)
           .reshape(Bp, S, SLAB_LANES))

    lm_f = lm[:B, :, 0:LM_OUT_SIZE]
    lm_b = lm[:B, :, LM_OUT_SIZE:2 * LM_OUT_SIZE]
    out = fin[:B, :, 0:CATEGORIES]
    return lm_f, lm_b, out


if __name__ == "__main__":
    key = jax.random.PRNGKey(0)
    pkey, dkey = jax.random.split(key)
    params = init_params(pkey)
    prep = prepare_params(params)                 # one-time repacking

    BATCH = 16                                    # 2 grid steps x 8 sequences
    sent_idx_seq = jax.random.randint(dkey, (BATCH, SEQ_LEN), 0, VOCAB_SIZE)
    # Unused with default flags (char_level='None', pos/rel/dep_word='No'):
    char_idx_seq = None
    pos = rel = dep_word = None

    lm_f_out, lm_b_out, out = seqnet_forward(prep, sent_idx_seq,
                                             char_idx_seq, pos, rel, dep_word)
    jax.block_until_ready((lm_f_out, lm_b_out, out))

    assert lm_f_out.shape == (BATCH, SEQ_LEN - 1, LM_OUT_SIZE)
    assert lm_b_out.shape == (BATCH, SEQ_LEN - 1, LM_OUT_SIZE)
    assert out.shape == (BATCH, SEQ_LEN, CATEGORIES)
    assert bool(jnp.all(jnp.isfinite(lm_f_out)))
    assert bool(jnp.all(jnp.isfinite(lm_b_out)))
    assert bool(jnp.all(jnp.isfinite(out)))
    print("KERNEL_OK")
</pallas_src>

<mosaic_0001>
module attributes {stable_mosaic.version = 11 : i64} {
  func.func @seqnet_kernel(%arg0: i32, %arg1: memref<1x64x2xi32, #tpu.memory_space<vmem>>, %arg2: memref<336x256xbf16, #tpu.memory_space<vmem>>, %arg3: memref<8x256xf32, #tpu.memory_space<vmem>>, %arg4: memref<1x120x128xf32, #tpu.memory_space<vmem>>) attributes {dimension_semantics = [#tpu.dimension_semantics<parallel>], iteration_bounds = array<i64: 2>, scalar_prefetch = 0 : i64, scratch_operands = 0 : i64, tpu.core_type = #tpu.core_type<tc>, window_params = [{transform_indices = @transform_0, window_bounds = array<i64: 1, 64, 2>}, {pipeline_mode = #tpu.pipeline_mode<synchronous>, transform_indices = @transform_1, window_bounds = array<i64: 336, 256>}, {pipeline_mode = #tpu.pipeline_mode<synchronous>, transform_indices = @transform_2, window_bounds = array<i64: 8, 256>}, {transform_indices = @transform_3, window_bounds = array<i64: 1, 120, 128>}]} {
    %c0 = arith.constant 0 : index
    %c0_0 = arith.constant 0 : index
    %c0_1 = arith.constant 0 : index
    %0 = vector.load %arg1[%c0, %c0_0, %c0_1] : memref<1x64x2xi32, #tpu.memory_space<vmem>>, vector<1x64x2xi32>
    %1 = vector.shape_cast %0 : vector<1x64x2xi32> to vector<64x2xi32>
    %2 = tpu.iota {dimensions = array<i32: 1>} : vector<64x48xi32>
    %3 = vector.extract_strided_slice %1 {offsets = [0, 0], sizes = [64, 1], strides = [1, 1]} : vector<64x2xi32> to vector<64x1xi32>
    %4 = vector.broadcast %3 : vector<64x1xi32> to vector<64x48xi32>
    %5 = arith.cmpi eq, %2, %4 : vector<64x48xi32>
    %6 = vector.extract_strided_slice %1 {offsets = [0, 1], sizes = [64, 1], strides = [1, 1]} : vector<64x2xi32> to vector<64x1xi32>
    %7 = vector.broadcast %6 : vector<64x1xi32> to vector<64x48xi32>
    %8 = arith.cmpi eq, %2, %7 : vector<64x48xi32>
    %9 = arith.ori %5, %8 : vector<64x48xi1>
    %cst = arith.constant 1.000000e+00 : f32
    %cst_2 = arith.constant 0.000000e+00 : f32
    %10 = vector.broadcast %cst : f32 to vector<64x48xf32>
    %11 = vector.broadcast %cst_2 : f32 to vector<64x48xf32>
    %12 = arith.select %9, %10, %11 : vector<64x48xi1>, vector<64x48xf32>
    %13 = arith.truncf %12 : vector<64x48xf32> to vector<64x48xbf16>
    %c0_3 = arith.constant 0 : index
    %c0_4 = arith.constant 0 : index
    %14 = vector.load %arg2[%c0_3, %c0_4] : memref<336x256xbf16, #tpu.memory_space<vmem>>, vector<48x256xbf16>
    %cst_5 = arith.constant dense<0.000000e+00> : vector<64x256xf32>
    %15 = tpu.matmul %13, %14, %cst_5 {dimension_numbers = #tpu.dot_dimension_numbers<[1], [0], [0], [1], [0, 0, 1, 1], [], []>} : vector<64x48xbf16>, vector<48x256xbf16>, vector<64x256xf32> -> vector<64x256xf32>
    %c0_6 = arith.constant 0 : index
    %c0_7 = arith.constant 0 : index
    %16 = vector.load %arg3[%c0_6, %c0_7] : memref<8x256xf32, #tpu.memory_space<vmem>>, vector<1x256xf32>
    %17 = vector.broadcast %16 : vector<1x256xf32> to vector<64x256xf32>
    %18 = arith.addf %15, %17 : vector<64x256xf32>
    %c48 = arith.constant 48 : index
    %c0_8 = arith.constant 0 : index
    %19 = vector.load %arg2[%c48, %c0_8] : memref<336x256xbf16, #tpu.memory_space<vmem>>, vector<64x256xbf16>
    %cst_9 = arith.constant 0.000000e+00 : f32
    %20 = vector.broadcast %cst_9 : f32 to vector<8x64xf32>
    %cst_10 = arith.constant 0.000000e+00 : f32
    %21 = vector.broadcast %cst_10 : f32 to vector<8x64xf32>
    %22 = vector.extract_strided_slice %18 {offsets = [0, 0], sizes = [8, 256], strides = [1, 1]} : vector<64x256xf32> to vector<8x256xf32>
    %23 = arith.truncf %20 : vector<8x64xf32> to vector<8x64xbf16>
    %cst_11 = arith.constant dense<0.000000e+00> : vector<8x256xf32>
    %24 = tpu.matmul %23, %19, %cst_11 {dimension_numbers = #tpu.dot_dimension_numbers<[1], [0], [0], [1], [0, 0, 1, 1], [], []>} : vector<8x64xbf16>, vector<64x256xbf16>, vector<8x256xf32> -> vector<8x256xf32>
    %25 = arith.addf %22, %24 : vector<8x256xf32>
    %26 = vector.extract_strided_slice %25 {offsets = [0, 0], sizes = [8, 192], strides = [1, 1]} : vector<8x256xf32> to vector<8x192xf32>
    %27 = arith.negf %26 : vector<8x192xf32>
    %28 = math.exp %27 : vector<8x192xf32>
    %cst_12 = arith.constant 1.000000e+00 : f32
    %29 = vector.broadcast %cst_12 : f32 to vector<8x192xf32>
    %30 = arith.addf %29, %28 : vector<8x192xf32>
    %31 = arith.divf %29, %30 : vector<8x192xf32>
    %32 = vector.extract_strided_slice %25 {offsets = [0, 192], sizes = [8, 64], strides = [1, 1]} : vector<8x256xf32> to vector<8x64xf32>
    %33 = math.tanh %32 : vector<8x64xf32>
    %34 = vector.extract_strided_slice %31 {offsets = [0, 0], sizes = [8, 64], strides = [1, 1]} : vector<8x192xf32> to vector<8x64xf32>
    %35 = vector.extract_strided_slice %31 {offsets = [0, 64], sizes = [8, 64], strides = [1, 1]} : vector<8x192xf32> to vector<8x64xf32>
    %36 = vector.extract_strided_slice %31 {offsets = [0, 128], sizes = [8, 64], strides = [1, 1]} : vector<8x192xf32> to vector<8x64xf32>
    %37 = arith.mulf %35, %21 : vector<8x64xf32>
    %38 = arith.mulf %34, %33 : vector<8x64xf32>
    %39 = arith.addf %37, %38 : vector<8x64xf32>
    %40 = math.tanh %39 : vector<8x64xf32>
    %41 = arith.mulf %36, %40 : vector<8x64xf32>
    %42 = vector.extract_strided_slice %18 {offsets = [8, 0], sizes = [8, 256], strides = [1, 1]} : vector<64x256xf32> to vector<8x256xf32>
    %43 = arith.truncf %41 : vector<8x64xf32> to vector<8x64xbf16>
    %cst_13 = arith.constant dense<0.000000e+00> : vector<8x256xf32>
    %44 = tpu.matmul %43, %19, %cst_13 {dimension_numbers = #tpu.dot_dimension_numbers<[1], [0], [0], [1], [0, 0, 1, 1], [], []>} : vector<8x64xbf16>, vector<64x256xbf16>, vector<8x256xf32> -> vector<8x256xf32>
    %45 = arith.addf %42, %44 : vector<8x256xf32>
    %46 = vector.extract_strided_slice %45 {offsets = [0, 0], sizes = [8, 192], strides = [1, 1]} : vector<8x256xf32> to vector<8x192xf32>
    %47 = arith.negf %46 : vector<8x192xf32>
    %48 = math.exp %47 : vector<8x192xf32>
    %cst_14 = arith.constant 1.000000e+00 : f32
    %49 = vector.broadcast %cst_14 : f32 to vector<8x192xf32>
    %50 = arith.addf %49, %48 : vector<8x192xf32>
    %51 = arith.divf %49, %50 : vector<8x192xf32>
    %52 = vector.extract_strided_slice %45 {offsets = [0, 192], sizes = [8, 64], strides = [1, 1]} : vector<8x256xf32> to vector<8x64xf32>
    %53 = math.tanh %52 : vector<8x64xf32>
    %54 = vector.extract_strided_slice %51 {offsets = [0, 0], sizes = [8, 64], strides = [1, 1]} : vector<8x192xf32> to vector<8x64xf32>
    %55 = vector.extract_strided_slice %51 {offsets = [0, 64], sizes = [8, 64], strides = [1, 1]} : vector<8x192xf32> to vector<8x64xf32>
    %56 = vector.extract_strided_slice %51 {offsets = [0, 128], sizes = [8, 64], strides = [1, 1]} : vector<8x192xf32> to vector<8x64xf32>
    %57 = arith.mulf %55, %39 : vector<8x64xf32>
    %58 = arith.mulf %54, %53 : vector<8x64xf32>
    %59 = arith.addf %57, %58 : vector<8x64xf32>
    %60 = math.tanh %59 : vector<8x64xf32>
    %61 = arith.mulf %56, %60 : vector<8x64xf32>
    %62 = vector.extract_strided_slice %18 {offsets = [16, 0], sizes = [8, 256], strides = [1, 1]} : vector<64x256xf32> to vector<8x256xf32>
    %63 = arith.truncf %61 : vector<8x64xf32> to vector<8x64xbf16>
    %cst_15 = arith.constant dense<0.000000e+00> : vector<8x256xf32>
    %64 = tpu.matmul %63, %19, %cst_15 {dimension_numbers = #tpu.dot_dimension_numbers<[1], [0], [0], [1], [0, 0, 1, 1], [], []>} : vector<8x64xbf16>, vector<64x256xbf16>, vector<8x256xf32> -> vector<8x256xf32>
    %65 = arith.addf %62, %64 : vector<8x256xf32>
    %66 = vector.extract_strided_slice %65 {offsets = [0, 0], sizes = [8, 192], strides = [1, 1]} : vector<8x256xf32> to vector<8x192xf32>
    %67 = arith.negf %66 : vector<8x192xf32>
    %68 = math.exp %67 : vector<8x192xf32>
    %cst_16 = arith.constant 1.000000e+00 : f32
    %69 = vector.broadcast %cst_16 : f32 to vector<8x192xf32>
    %70 = arith.addf %69, %68 : vector<8x192xf32>
    %71 = arith.divf %69, %70 : vector<8x192xf32>
    %72 = vector.extract_strided_slice %65 {offsets = [0, 192], sizes = [8, 64], strides = [1, 1]} : vector<8x256xf32> to vector<8x64xf32>
    %73 = math.tanh %72 : vector<8x64xf32>
    %74 = vector.extract_strided_slice %71 {offsets = [0, 0], sizes = [8, 64], strides = [1, 1]} : vector<8x192xf32> to vector<8x64xf32>
    %75 = vector.extract_strided_slice %71 {offsets = [0, 64], sizes = [8, 64], strides = [1, 1]} : vector<8x192xf32> to vector<8x64xf32>
    %76 = vector.extract_strided_slice %71 {offsets = [0, 128], sizes = [8, 64], strides = [1, 1]} : vector<8x192xf32> to vector<8x64xf32>
    %77 = arith.mulf %75, %59 : vector<8x64xf32>
    %78 = arith.mulf %74, %73 : vector<8x64xf32>
    %79 = arith.addf %77, %78 : vector<8x64xf32>
    %80 = math.tanh %79 : vector<8x64xf32>
    %81 = arith.mulf %76, %80 : vector<8x64xf32>
    %82 = vector.extract_strided_slice %18 {offsets = [24, 0], sizes = [8, 256], strides = [1, 1]} : vector<64x256xf32> to vector<8x256xf32>
    %83 = arith.truncf %81 : vector<8x64xf32> to vector<8x64xbf16>
    %cst_17 = arith.constant dense<0.000000e+00> : vector<8x256xf32>
    %84 = tpu.matmul %83, %19, %cst_17 {dimension_numbers = #tpu.dot_dimension_numbers<[1], [0], [0], [1], [0, 0, 1, 1], [], []>} : vector<8x64xbf16>, vector<64x256xbf16>, vector<8x256xf32> -> vector<8x256xf32>
    %85 = arith.addf %82, %84 : vector<8x256xf32>
    %86 = vector.extract_strided_slice %85 {offsets = [0, 0], sizes = [8, 192], strides = [1, 1]} : vector<8x256xf32> to vector<8x192xf32>
    %87 = arith.negf %86 : vector<8x192xf32>
    %88 = math.exp %87 : vector<8x192xf32>
    %cst_18 = arith.constant 1.000000e+00 : f32
    %89 = vector.broadcast %cst_18 : f32 to vector<8x192xf32>
    %90 = arith.addf %89, %88 : vector<8x192xf32>
    %91 = arith.divf %89, %90 : vector<8x192xf32>
    %92 = vector.extract_strided_slice %85 {offsets = [0, 192], sizes = [8, 64], strides = [1, 1]} : vector<8x256xf32> to vector<8x64xf32>
    %93 = math.tanh %92 : vector<8x64xf32>
    %94 = vector.extract_strided_slice %91 {offsets = [0, 0], sizes = [8, 64], strides = [1, 1]} : vector<8x192xf32> to vector<8x64xf32>
    %95 = vector.extract_strided_slice %91 {offsets = [0, 64], sizes = [8, 64], strides = [1, 1]} : vector<8x192xf32> to vector<8x64xf32>
    %96 = vector.extract_strided_slice %91 {offsets = [0, 128], sizes = [8, 64], strides = [1, 1]} : vector<8x192xf32> to vector<8x64xf32>
    %97 = arith.mulf %95, %79 : vector<8x64xf32>
    %98 = arith.mulf %94, %93 : vector<8x64xf32>
    %99 = arith.addf %97, %98 : vector<8x64xf32>
    %100 = math.tanh %99 : vector<8x64xf32>
    %101 = arith.mulf %96, %100 : vector<8x64xf32>
    %102 = vector.extract_strided_slice %18 {offsets = [32, 0], sizes = [8, 256], strides = [1, 1]} : vector<64x256xf32> to vector<8x256xf32>
    %103 = arith.truncf %101 : vector<8x64xf32> to vector<8x64xbf16>
    %cst_19 = arith.constant dense<0.000000e+00> : vector<8x256xf32>
    %104 = tpu.matmul %103, %19, %cst_19 {dimension_numbers = #tpu.dot_dimension_numbers<[1], [0], [0], [1], [0, 0, 1, 1], [], []>} : vector<8x64xbf16>, vector<64x256xbf16>, vector<8x256xf32> -> vector<8x256xf32>
    %105 = arith.addf %102, %104 : vector<8x256xf32>
    %106 = vector.extract_strided_slice %105 {offsets = [0, 0], sizes = [8, 192], strides = [1, 1]} : vector<8x256xf32> to vector<8x192xf32>
    %107 = arith.negf %106 : vector<8x192xf32>
    %108 = math.exp %107 : vector<8x192xf32>
    %cst_20 = arith.constant 1.000000e+00 : f32
    %109 = vector.broadcast %cst_20 : f32 to vector<8x192xf32>
    %110 = arith.addf %109, %108 : vector<8x192xf32>
    %111 = arith.divf %109, %110 : vector<8x192xf32>
    %112 = vector.extract_strided_slice %105 {offsets = [0, 192], sizes = [8, 64], strides = [1, 1]} : vector<8x256xf32> to vector<8x64xf32>
    %113 = math.tanh %112 : vector<8x64xf32>
    %114 = vector.extract_strided_slice %111 {offsets = [0, 0], sizes = [8, 64], strides = [1, 1]} : vector<8x192xf32> to vector<8x64xf32>
    %115 = vector.extract_strided_slice %111 {offsets = [0, 64], sizes = [8, 64], strides = [1, 1]} : vector<8x192xf32> to vector<8x64xf32>
    %116 = vector.extract_strided_slice %111 {offsets = [0, 128], sizes = [8, 64], strides = [1, 1]} : vector<8x192xf32> to vector<8x64xf32>
    %117 = arith.mulf %115, %99 : vector<8x64xf32>
    %118 = arith.mulf %114, %113 : vector<8x64xf32>
    %119 = arith.addf %117, %118 : vector<8x64xf32>
    %120 = math.tanh %119 : vector<8x64xf32>
    %121 = arith.mulf %116, %120 : vector<8x64xf32>
    %122 = vector.extract_strided_slice %18 {offsets = [40, 0], sizes = [8, 256], strides = [1, 1]} : vector<64x256xf32> to vector<8x256xf32>
    %123 = arith.truncf %121 : vector<8x64xf32> to vector<8x64xbf16>
    %cst_21 = arith.constant dense<0.000000e+00> : vector<8x256xf32>
    %124 = tpu.matmul %123, %19, %cst_21 {dimension_numbers = #tpu.dot_dimension_numbers<[1], [0], [0], [1], [0, 0, 1, 1], [], []>} : vector<8x64xbf16>, vector<64x256xbf16>, vector<8x256xf32> -> vector<8x256xf32>
    %125 = arith.addf %122, %124 : vector<8x256xf32>
    %126 = vector.extract_strided_slice %125 {offsets = [0, 0], sizes = [8, 192], strides = [1, 1]} : vector<8x256xf32> to vector<8x192xf32>
    %127 = arith.negf %126 : vector<8x192xf32>
    %128 = math.exp %127 : vector<8x192xf32>
    %cst_22 = arith.constant 1.000000e+00 : f32
    %129 = vector.broadcast %cst_22 : f32 to vector<8x192xf32>
    %130 = arith.addf %129, %128 : vector<8x192xf32>
    %131 = arith.divf %129, %130 : vector<8x192xf32>
    %132 = vector.extract_strided_slice %125 {offsets = [0, 192], sizes = [8, 64], strides = [1, 1]} : vector<8x256xf32> to vector<8x64xf32>
    %133 = math.tanh %132 : vector<8x64xf32>
    %134 = vector.extract_strided_slice %131 {offsets = [0, 0], sizes = [8, 64], strides = [1, 1]} : vector<8x192xf32> to vector<8x64xf32>
    %135 = vector.extract_strided_slice %131 {offsets = [0, 64], sizes = [8, 64], strides = [1, 1]} : vector<8x192xf32> to vector<8x64xf32>
    %136 = vector.extract_strided_slice %131 {offsets = [0, 128], sizes = [8, 64], strides = [1, 1]} : vector<8x192xf32> to vector<8x64xf32>
    %137 = arith.mulf %135, %119 : vector<8x64xf32>
    %138 = arith.mulf %134, %133 : vector<8x64xf32>
    %139 = arith.addf %137, %138 : vector<8x64xf32>
    %140 = math.tanh %139 : vector<8x64xf32>
    %141 = arith.mulf %136, %140 : vector<8x64xf32>
    %142 = vector.extract_strided_slice %18 {offsets = [48, 0], sizes = [8, 256], strides = [1, 1]} : vector<64x256xf32> to vector<8x256xf32>
    %143 = arith.truncf %141 : vector<8x64xf32> to vector<8x64xbf16>
    %cst_23 = arith.constant dense<0.000000e+00> : vector<8x256xf32>
    %144 = tpu.matmul %143, %19, %cst_23 {dimension_numbers = #tpu.dot_dimension_numbers<[1], [0], [0], [1], [0, 0, 1, 1], [], []>} : vector<8x64xbf16>, vector<64x256xbf16>, vector<8x256xf32> -> vector<8x256xf32>
    %145 = arith.addf %142, %144 : vector<8x256xf32>
    %146 = vector.extract_strided_slice %145 {offsets = [0, 0], sizes = [8, 192], strides = [1, 1]} : vector<8x256xf32> to vector<8x192xf32>
    %147 = arith.negf %146 : vector<8x192xf32>
    %148 = math.exp %147 : vector<8x192xf32>
    %cst_24 = arith.constant 1.000000e+00 : f32
    %149 = vector.broadcast %cst_24 : f32 to vector<8x192xf32>
    %150 = arith.addf %149, %148 : vector<8x192xf32>
    %151 = arith.divf %149, %150 : vector<8x192xf32>
    %152 = vector.extract_strided_slice %145 {offsets = [0, 192], sizes = [8, 64], strides = [1, 1]} : vector<8x256xf32> to vector<8x64xf32>
    %153 = math.tanh %152 : vector<8x64xf32>
    %154 = vector.extract_strided_slice %151 {offsets = [0, 0], sizes = [8, 64], strides = [1, 1]} : vector<8x192xf32> to vector<8x64xf32>
    %155 = vector.extract_strided_slice %151 {offsets = [0, 64], sizes = [8, 64], strides = [1, 1]} : vector<8x192xf32> to vector<8x64xf32>
    %156 = vector.extract_strided_slice %151 {offsets = [0, 128], sizes = [8, 64], strides = [1, 1]} : vector<8x192xf32> to vector<8x64xf32>
    %157 = arith.mulf %155, %139 : vector<8x64xf32>
    %158 = arith.mulf %154, %153 : vector<8x64xf32>
    %159 = arith.addf %157, %158 : vector<8x64xf32>
    %160 = math.tanh %159 : vector<8x64xf32>
    %161 = arith.mulf %156, %160 : vector<8x64xf32>
    %162 = vector.extract_strided_slice %18 {offsets = [56, 0], sizes = [8, 256], strides = [1, 1]} : vector<64x256xf32> to vector<8x256xf32>
    %163 = arith.truncf %161 : vector<8x64xf32> to vector<8x64xbf16>
    %cst_25 = arith.constant dense<0.000000e+00> : vector<8x256xf32>
    %164 = tpu.matmul %163, %19, %cst_25 {dimension_numbers = #tpu.dot_dimension_numbers<[1], [0], [0], [1], [0, 0, 1, 1], [], []>} : vector<8x64xbf16>, vector<64x256xbf16>, vector<8x256xf32> -> vector<8x256xf32>
    %165 = arith.addf %162, %164 : vector<8x256xf32>
    %166 = vector.extract_strided_slice %165 {offsets = [0, 0], sizes = [8, 192], strides = [1, 1]} : vector<8x256xf32> to vector<8x192xf32>
    %167 = arith.negf %166 : vector<8x192xf32>
    %168 = math.exp %167 : vector<8x192xf32>
    %cst_26 = arith.constant 1.000000e+00 : f32
    %169 = vector.broadcast %cst_26 : f32 to vector<8x192xf32>
    %170 = arith.addf %169, %168 : vector<8x192xf32>
    %171 = arith.divf %169, %170 : vector<8x192xf32>
    %172 = vector.extract_strided_slice %165 {offsets = [0, 192], sizes = [8, 64], strides = [1, 1]} : vector<8x256xf32> to vector<8x64xf32>
    %173 = math.tanh %172 : vector<8x64xf32>
    %174 = vector.extract_strided_slice %171 {offsets = [0, 0], sizes = [8, 64], strides = [1, 1]} : vector<8x192xf32> to vector<8x64xf32>
    %175 = vector.extract_strided_slice %171 {offsets = [0, 64], sizes = [8, 64], strides = [1, 1]} : vector<8x192xf32> to vector<8x64xf32>
    %176 = vector.extract_strided_slice %171 {offsets = [0, 128], sizes = [8, 64], strides = [1, 1]} : vector<8x192xf32> to vector<8x64xf32>
    %177 = arith.mulf %175, %159 : vector<8x64xf32>
    %178 = arith.mulf %174, %173 : vector<8x64xf32>
    %179 = arith.addf %177, %178 : vector<8x64xf32>
    %180 = math.tanh %179 : vector<8x64xf32>
    %181 = arith.mulf %176, %180 : vector<8x64xf32>
    %182 = vector.extract_strided_slice %41 {offsets = [0, 0], sizes = [8, 32], strides = [1, 1]} : vector<8x64xf32> to vector<8x32xf32>
    %183 = vector.extract_strided_slice %161 {offsets = [0, 32], sizes = [8, 32], strides = [1, 1]} : vector<8x64xf32> to vector<8x32xf32>
    %184 = tpu.concatenate %182, %183 in 1 : vector<8x32xf32>, vector<8x32xf32> -> vector<8x64xf32>
    %185 = vector.extract_strided_slice %61 {offsets = [0, 0], sizes = [8, 32], strides = [1, 1]} : vector<8x64xf32> to vector<8x32xf32>
    %186 = vector.extract_strided_slice %141 {offsets = [0, 32], sizes = [8, 32], strides = [1, 1]} : vector<8x64xf32> to vector<8x32xf32>
    %187 = tpu.concatenate %185, %186 in 1 : vector<8x32xf32>, vector<8x32xf32> -> vector<8x64xf32>
    %188 = vector.extract_strided_slice %81 {offsets = [0, 0], sizes = [8, 32], strides = [1, 1]} : vector<8x64xf32> to vector<8x32xf32>
    %189 = vector.extract_strided_slice %121 {offsets = [0, 32], sizes = [8, 32], strides = [1, 1]} : vector<8x64xf32> to vector<8x32xf32>
    %190 = tpu.concatenate %188, %189 in 1 : vector<8x32xf32>, vector<8x32xf32> -> vector<8x64xf32>
    %191 = vector.extract_strided_slice %101 {offsets = [0, 0], sizes = [8, 32], strides = [1, 1]} : vector<8x64xf32> to vector<8x32xf32>
    %192 = vector.extract_strided_slice %101 {offsets = [0, 32], sizes = [8, 32], strides = [1, 1]} : vector<8x64xf32> to vector<8x32xf32>
    %193 = tpu.concatenate %191, %192 in 1 : vector<8x32xf32>, vector<8x32xf32> -> vector<8x64xf32>
    %194 = vector.extract_strided_slice %121 {offsets = [0, 0], sizes = [8, 32], strides = [1, 1]} : vector<8x64xf32> to vector<8x32xf32>
    %195 = vector.extract_strided_slice %81 {offsets = [0, 32], sizes = [8, 32], strides = [1, 1]} : vector<8x64xf32> to vector<8x32xf32>
    %196 = tpu.concatenate %194, %195 in 1 : vector<8x32xf32>, vector<8x32xf32> -> vector<8x64xf32>
    %197 = vector.extract_strided_slice %141 {offsets = [0, 0], sizes = [8, 32], strides = [1, 1]} : vector<8x64xf32> to vector<8x32xf32>
    %198 = vector.extract_strided_slice %61 {offsets = [0, 32], sizes = [8, 32], strides = [1, 1]} : vector<8x64xf32> to vector<8x32xf32>
    %199 = tpu.concatenate %197, %198 in 1 : vector<8x32xf32>, vector<8x32xf32> -> vector<8x64xf32>
    %200 = vector.extract_strided_slice %161 {offsets = [0, 0], sizes = [8, 32], strides = [1, 1]} : vector<8x64xf32> to vector<8x32xf32>
    %201 = vector.extract_strided_slice %41 {offsets = [0, 32], sizes = [8, 32], strides = [1, 1]} : vector<8x64xf32> to vector<8x32xf32>
    %202 = tpu.concatenate %200, %201 in 1 : vector<8x32xf32>, vector<8x32xf32> -> vector<8x64xf32>
    %203 = tpu.concatenate %184, %187, %190, %193, %196, %199, %202 in 0 : vector<8x64xf32>, vector<8x64xf32>, vector<8x64xf32>, vector<8x64xf32>, vector<8x64xf32>, vector<8x64xf32>, vector<8x64xf32> -> vector<56x64xf32>
    %c112 = arith.constant 112 : index
    %c0_27 = arith.constant 0 : index
    %204 = vector.load %arg2[%c112, %c0_27] : memref<336x256xbf16, #tpu.memory_space<vmem>>, vector<64x64xbf16>
    %205 = arith.truncf %203 : vector<56x64xf32> to vector<56x64xbf16>
    %cst_28 = arith.constant dense<0.000000e+00> : vector<56x64xf32>
    %206 = tpu.matmul %205, %204, %cst_28 {dimension_numbers = #tpu.dot_dimension_numbers<[1], [0], [0], [1], [0, 0, 1, 1], [], []>} : vector<56x64xbf16>, vector<64x64xbf16>, vector<56x64xf32> -> vector<56x64xf32>
    %c1 = arith.constant 1 : index
    %c0_29 = arith.constant 0 : index
    %207 = vector.load %arg3[%c1, %c0_29] : memref<8x256xf32, #tpu.memory_space<vmem>>, vector<1x64xf32>
    %208 = vector.broadcast %207 : vector<1x64xf32> to vector<56x64xf32>
    %209 = arith.addf %206, %208 : vector<56x64xf32>
    %cst_30 = arith.constant 0.000000e+00 : f32
    %210 = vector.broadcast %cst_30 : f32 to vector<56x64xf32>
    %211 = arith.maximumf %209, %210 : vector<56x64xf32>
    %c176 = arith.constant 176 : index
    %c0_31 = arith.constant 0 : index
    %212 = vector.load %arg2[%c176, %c0_31] : memref<336x256xbf16, #tpu.memory_space<vmem>>, vector<64x128xbf16>
    %213 = arith.truncf %211 : vector<56x64xf32> to vector<56x64xbf16>
    %cst_32 = arith.constant dense<0.000000e+00> : vector<56x128xf32>
    %214 = tpu.matmul %213, %212, %cst_32 {dimension_numbers = #tpu.dot_dimension_numbers<[1], [0], [0], [1], [0, 0, 1, 1], [], []>} : vector<56x64xbf16>, vector<64x128xbf16>, vector<56x128xf32> -> vector<56x128xf32>
    %c2 = arith.constant 2 : index
    %c0_33 = arith.constant 0 : index
    %215 = vector.load %arg3[%c2, %c0_33] : memref<8x256xf32, #tpu.memory_space<vmem>>, vector<1x128xf32>
    %216 = vector.broadcast %215 : vector<1x128xf32> to vector<56x128xf32>
    %217 = arith.addf %214, %216 : vector<56x128xf32>
    %218 = vector.extract_strided_slice %41 {offsets = [0, 0], sizes = [8, 32], strides = [1, 1]} : vector<8x64xf32> to vector<8x32xf32>
    %219 = vector.extract_strided_slice %181 {offsets = [0, 32], sizes = [8, 32], strides = [1, 1]} : vector<8x64xf32> to vector<8x32xf32>
    %220 = tpu.concatenate %218, %219 in 1 : vector<8x32xf32>, vector<8x32xf32> -> vector<8x64xf32>
    %221 = vector.extract_strided_slice %61 {offsets = [0, 0], sizes = [8, 32], strides = [1, 1]} : vector<8x64xf32> to vector<8x32xf32>
    %222 = vector.extract_strided_slice %161 {offsets = [0, 32], sizes = [8, 32], strides = [1, 1]} : vector<8x64xf32> to vector<8x32xf32>
    %223 = tpu.concatenate %221, %222 in 1 : vector<8x32xf32>, vector<8x32xf32> -> vector<8x64xf32>
    %224 = vector.extract_strided_slice %81 {offsets = [0, 0], sizes = [8, 32], strides = [1, 1]} : vector<8x64xf32> to vector<8x32xf32>
    %225 = vector.extract_strided_slice %141 {offsets = [0, 32], sizes = [8, 32], strides = [1, 1]} : vector<8x64xf32> to vector<8x32xf32>
    %226 = tpu.concatenate %224, %225 in 1 : vector<8x32xf32>, vector<8x32xf32> -> vector<8x64xf32>
    %227 = vector.extract_strided_slice %101 {offsets = [0, 0], sizes = [8, 32], strides = [1, 1]} : vector<8x64xf32> to vector<8x32xf32>
    %228 = vector.extract_strided_slice %121 {offsets = [0, 32], sizes = [8, 32], strides = [1, 1]} : vector<8x64xf32> to vector<8x32xf32>
    %229 = tpu.concatenate %227, %228 in 1 : vector<8x32xf32>, vector<8x32xf32> -> vector<8x64xf32>
    %230 = vector.extract_strided_slice %121 {offsets = [0, 0], sizes = [8, 32], strides = [1, 1]} : vector<8x64xf32> to vector<8x32xf32>
    %231 = vector.extract_strided_slice %101 {offsets = [0, 32], sizes = [8, 32], strides = [1, 1]} : vector<8x64xf32> to vector<8x32xf32>
    %232 = tpu.concatenate %230, %231 in 1 : vector<8x32xf32>, vector<8x32xf32> -> vector<8x64xf32>
    %233 = vector.extract_strided_slice %141 {offsets = [0, 0], sizes = [8, 32], strides = [1, 1]} : vector<8x64xf32> to vector<8x32xf32>
    %234 = vector.extract_strided_slice %81 {offsets = [0, 32], sizes = [8, 32], strides = [1, 1]} : vector<8x64xf32> to vector<8x32xf32>
    %235 = tpu.concatenate %233, %234 in 1 : vector<8x32xf32>, vector<8x32xf32> -> vector<8x64xf32>
    %236 = vector.extract_strided_slice %161 {offsets = [0, 0], sizes = [8, 32], strides = [1, 1]} : vector<8x64xf32> to vector<8x32xf32>
    %237 = vector.extract_strided_slice %61 {offsets = [0, 32], sizes = [8, 32], strides = [1, 1]} : vector<8x64xf32> to vector<8x32xf32>
    %238 = tpu.concatenate %236, %237 in 1 : vector<8x32xf32>, vector<8x32xf32> -> vector<8x64xf32>
    %239 = vector.extract_strided_slice %181 {offsets = [0, 0], sizes = [8, 32], strides = [1, 1]} : vector<8x64xf32> to vector<8x32xf32>
    %240 = vector.extract_strided_slice %41 {offsets = [0, 32], sizes = [8, 32], strides = [1, 1]} : vector<8x64xf32> to vector<8x32xf32>
    %241 = tpu.concatenate %239, %240 in 1 : vector<8x32xf32>, vector<8x32xf32> -> vector<8x64xf32>
    %242 = tpu.concatenate %220, %223, %226, %229, %232, %235, %238, %241 in 0 : vector<8x64xf32>, vector<8x64xf32>, vector<8x64xf32>, vector<8x64xf32>, vector<8x64xf32>, vector<8x64xf32>, vector<8x64xf32>, vector<8x64xf32> -> vector<64x64xf32>
    %c240 = arith.constant 240 : index
    %c0_34 = arith.constant 0 : index
    %243 = vector.load %arg2[%c240, %c0_34] : memref<336x256xbf16, #tpu.memory_space<vmem>>, vector<64x32xbf16>
    %244 = arith.truncf %242 : vector<64x64xf32> to vector<64x64xbf16>
    %cst_35 = arith.constant dense<0.000000e+00> : vector<64x32xf32>
    %245 = tpu.matmul %244, %243, %cst_35 {dimension_numbers = #tpu.dot_dimension_numbers<[1], [0], [0], [1], [0, 0, 1, 1], [], []>} : vector<64x64xbf16>, vector<64x32xbf16>, vector<64x32xf32> -> vector<64x32xf32>
    %c3 = arith.constant 3 : index
    %c0_36 = arith.constant 0 : index
    %246 = vector.load %arg3[%c3, %c0_36] : memref<8x256xf32, #tpu.memory_space<vmem>>, vector<1x32xf32>
    %247 = vector.broadcast %246 : vector<1x32xf32> to vector<64x32xf32>
    %248 = arith.addf %245, %247 : vector<64x32xf32>
    %249 = arith.negf %248 : vector<64x32xf32>
    %250 = math.exp %249 : vector<64x32xf32>
    %cst_37 = arith.constant 1.000000e+00 : f32
    %251 = vector.broadcast %cst_37 : f32 to vector<64x32xf32>
    %252 = arith.addf %251, %250 : vector<64x32xf32>
    %253 = arith.divf %251, %252 : vector<64x32xf32>
    %c304 = arith.constant 304 : index
    %c0_38 = arith.constant 0 : index
    %254 = vector.load %arg2[%c304, %c0_38] : memref<336x256xbf16, #tpu.memory_space<vmem>>, vector<32x128xbf16>
    %255 = arith.truncf %253 : vector<64x32xf32> to vector<64x32xbf16>
    %cst_39 = arith.constant dense<0.000000e+00> : vector<64x128xf32>
    %256 = tpu.matmul %255, %254, %cst_39 {dimension_numbers = #tpu.dot_dimension_numbers<[1], [0], [0], [1], [0, 0, 1, 1], [], []>} : vector<64x32xbf16>, vector<32x128xbf16>, vector<64x128xf32> -> vector<64x128xf32>
    %c4 = arith.constant 4 : index
    %c0_40 = arith.constant 0 : index
    %257 = vector.load %arg3[%c4, %c0_40] : memref<8x256xf32, #tpu.memory_space<vmem>>, vector<1x128xf32>
    %258 = vector.broadcast %257 : vector<1x128xf32> to vector<64x128xf32>
    %259 = arith.addf %256, %258 : vector<64x128xf32>
    %260 = tpu.concatenate %217, %259 in 0 : vector<56x128xf32>, vector<64x128xf32> -> vector<120x128xf32>
    %c0_41 = arith.constant 0 : index
    %c0_42 = arith.constant 0 : index
    %c0_43 = arith.constant 0 : index
    %261 = vector.load %arg4[%c0_41, %c0_42, %c0_43] : memref<1x120x128xf32, #tpu.memory_space<vmem>>, vector<1x120x128xf32>
    %262 = vector.shape_cast %261 : vector<1x120x128xf32> to vector<120x128xf32>
    %263 = vector.shape_cast %260 : vector<120x128xf32> to vector<1x120x128xf32>
    tpu.vector_store %arg4[%c0_41, %c0_42, %c0_43], %263 {strides = array<i32>} : memref<1x120x128xf32, #tpu.memory_space<vmem>>, vector<1x120x128xf32>,
    return
  }
  func.func @transform_0(%arg0: i32) -> (i32, i32, i32) {
    %c0_i32 = arith.constant 0 : i32
    %c0_i32_0 = arith.constant 0 : i32
    %c0_i32_1 = arith.constant 0 : i32
    return %arg0, %c0_i32, %c0_i32_0 : i32, i32, i32
  }
  func.func @transform_1(%arg0: i32) -> (i32, i32) {
    %c0_i32 = arith.constant 0 : i32
    %c0_i32_0 = arith.constant 0 : i32
    %c0_i32_1 = arith.constant 0 : i32
    return %c0_i32, %c0_i32_0 : i32, i32
  }
  func.func @transform_2(%arg0: i32) -> (i32, i32) {
    %c0_i32 = arith.constant 0 : i32
    %c0_i32_0 = arith.constant 0 : i32
    %c0_i32_1 = arith.constant 0 : i32
    return %c0_i32, %c0_i32_0 : i32, i32
  }
  func.func @transform_3(%arg0: i32) -> (i32, i32, i32) {
    %c0_i32 = arith.constant 0 : i32
    %c0_i32_0 = arith.constant 0 : i32
    %c0_i32_1 = arith.constant 0 : i32
    return %arg0, %c0_i32, %c0_i32_0 : i32, i32, i32
  }
}

</mosaic_0001>

<bundles_post_ra>
// kernel: seqnet_forward.1
= control target key start
LH: loop header
LB: loop body
LE: loop exit
PB: predicated region body
PF: predicated region fallthrough
CT: control target
= control target key end

     0   :  { %8 = vsyncpa [#allocation3], 0  ;;  %s2118_s12 = smov 0   ;;  %s2561_s0 = inlined_call_operand.vmem [shape: s32[2,64,2], index: 0, kind: input, shape index: {}]   ;;  %s2562_s1 = inlined_call_operand.hbm [shape: bf16[336,256], index: 1, kind: input, shape index: {}]   ;;  %s2563_s2 = inlined_call_operand.vmem [shape: f32[8,256], index: 2, kind: input, shape index: {}]   ;;  %s2564_s3 = inlined_call_operand.vmem [shape: f32[2,120,128], index: 3, kind: output, shape index: {}]  }
   0x1 LB: > { %s2124_s13 = sadd.s32 4294967295, %s2089_s12   ;;  %p1671_p0 = scmp.ge.s32.totalorder %s2089_s12, 1  ;;  %s2089_s12 = sphi %s2118_s12, %s14_s12  }
   0x2   : > { %p113_p1 = scmp.lt.s32.totalorder %s2089_s12, 3  ;;  %s2091_s14 = smov [#allocation2]  }
   0x3   : > { %s125_s15 = sshll.u32 %s2091_s14, 4  ;;  %p2565_p3 = scmp.eq.s32.totalorder %s2124_s13, 0  ;;  %s126_s15 = int_to_ptr.vmem [resolvable:$true] %s125_s15 }
   0x4   : > { %p2128_p2 = pnand %p1671_p0, %p113_p1  ;;  %s2051_s20 = scalar_lea.hbm %s2562_s1, 5376 }
   0x5   : > { %p2052_p6 = scmp.ne.s32.totalorder %s2562_s1, %s2051_s20  ;;  %p2058_p10 = scmp.lt.u32.totalorder %s2051_s20, %s2562_s1 }
   0x6   : > { %s2567_s16 = scalar_select %p2128_p2, 1, 0 }
   0x7   : > { %p1856_p4 = pneg %p2128_p2 }
   0x9   : > { %p2137_p5 = pnand %p2565_p3, %p1856_p4 }
   0xb   : > { %p2053_p7 = pneg %p2137_p5 }
   0xd   : > { %p2054_p8 = pnand %p2053_p7, %p2052_p6 }
   0xf   : > { %p2055_p9 = pneg %p2054_p8 }
  0x11   : > { %p2060_p11 = pnand %p2058_p10, %p2055_p9 }
  0x13   : > { %2063 = shalt.err (!%p2060_p11)
}
  0x14   : > { %s2064_s25 = scalar_lea.vmem %s126_s15, 5376  ;;  %p2072_p1 = scmp.lt.s32.totalorder %s126_s15, %s126_s15 }
  0x15   : > { %p2065_p12 = scmp.ne.s32.totalorder %s126_s15, %s2064_s25  ;;  %p2073_p4 = scmp.lt.s32.totalorder %s2064_s25, %s2064_s25 }
  0x17   : > { %p2067_p13 = pnand %p2065_p12, %p2053_p7  ;;  %p2074_p3 = por %p2073_p4, %p2072_p1 }
  0x19   : > { %p2068_p0 = pneg %p2067_p13 }
  0x1b   : > { %p2075_p2 = pnand %p2074_p3, %p2068_p0 }
  0x1d   : > { %2078 = shalt.err (!%p2075_p2)
}
  0x1e   : > { %s2092_s26 = smov 128   ;;  %s2093_s27 = smov 8  }
  0x1f   : > { %1859 = dma.hbm_to_vmem [thread:$0]  (!%p2137_p5), %s2562_s1, 5376, %s126_s15, [#allocation3], %s2092_s26, %s2092_s26, %s2093_s27  }
  0x20   : > { %p2569_p6 = scmp.ne.s32.totalorder %s2567_s16, 0 }
  0x21   : > { %p2570_p8 = scmp.eq.s32.totalorder (!%p2569_p6), %s2124_s13, 0 }
  0x22   : > { %152 = sbr.rel (%p2569_p6) target bundleno = 5381 (0x1505), region = 32 }
  0x29   : > { %2084 = dma.done.wait (%p2570_p8), [#allocation3], 5376   ;;  %p2571_p7 = pmov %p2570_p8 }
  0x2a   : > { %p176_p2 = scmp.lt.s32.totalorder %s2124_s13, 1  ;;  %v2094_v0 = vmov 1   ;;  %v2095_v1 = vmov 0   ;;  %v2179_v4 = vld [vmem:[#allocation2 + $0x34] ss:$8 sps:$4 sm:$0xff]   ;;  %v195_v18 = vlaneseq  ;;  %v2096_v24 = vmov 0.0  }
  0x2b   : > { %2086 = vsyncadd (%p2571_p7), [#allocation3], 4294961920  ;;  %1878 = vset.pattern.permute.xlu1 %v2094_v0  ;;  %1877 = vset.pattern.permute.xlu0 %v2095_v1  ;;  %v2181_v5 = vld [vmem:[#allocation2 + $0x30] ss:$8 sps:$4 sm:$0xff]   ;;  %v2183_v6 = vld [vmem:[#allocation2 + $0x44] ss:$8 sps:$4 sm:$0xff]  }
  0x2c   : > { %s2573_s13 = smov (!%p176_p2, %s2124_s13), 1  ;;  %499 = vmatprep.mubr.bf16.mxu1 %v2095_v1  ;;  %374 = vmatprep.mubr.bf16.mxu0 %v2095_v1  ;;  %v1893_v7 = vld [vmem:[#allocation2 + $0x4] ss:$8 sps:$4 sm:$0xff]   ;;  %v2187_v8 = vld [vmem:[#allocation2 + $0x40] ss:$8 sps:$4 sm:$0xff]   ;;  %v2216_v19 = vand.u32 127, %v195_v18 }
  0x2d   : > { %s1760_s30 = sshll.u32 %s2573_s13, 6  ;;  %467 = vmatprep.subr.bf16.mxu1 %v2179_v4  ;;  %v1896_v9 = vld [vmem:[#allocation2] ss:$8 sps:$4 sm:$0xff]   ;;  %v2189_v10 = vld [vmem:[#allocation2 + $0x54] ss:$8 sps:$4 sm:$0xff]   ;;  %342 = vmatprep.subr.bf16.mxu0 %v1893_v7  ;;  %vm329_vm6 = vcmask 392192  }
  0x2e   : > { %s2175_s6 = scalar_lea.vmem %s2561_s0, %s1760_s30  ;;  %468 = vmatpush1.bf16.msra.mxu1 %v2181_v5  ;;  %v1899_v11 = vld [vmem:[#allocation2 + $0x14] ss:$8 sps:$4 sm:$0xff]   ;;  %343 = vmatpush1.bf16.msra.mxu0 %v1896_v9  ;;  %v1902_v12 = vld [vmem:[#allocation2 + $0x10] ss:$8 sps:$4 sm:$0xff]   ;;  %v2196_v14 = vld [vmem:[#allocation2 + $0x64] ss:$8 sps:$4 sm:$0xff]  }
  0x2f   : > { %v187_v2 = vld [vmem:[%s2175_s6] sm:$0xff]  ;;  %v188_v3 = vld [vmem:[%s2175_s6 + $0x8] sm:$0xff]  ;;  %469 = vmatprep.subr.bf16.mxu1 %v2183_v6  ;;  %344 = vmatprep.subr.bf16.mxu0 %v1899_v11  ;;  %v2193_v13 = vld [vmem:[#allocation2 + $0x50] ss:$8 sps:$4 sm:$0xff]   ;;  %v290_v32 = vshrl.u32 %v195_v18, 7  ;;  %s2097_s9 = smov 64  }
  0x30   : > { %230 = vperm.xlu1 %1878, %v187_v2   ;;  %198 = vperm.xlu0 %1877, %v187_v2   ;;  %v1905_v15 = vld [vmem:[#allocation2 + $0x24] ss:$8 sps:$4 sm:$0xff]   ;;  %v1908_v16 = vld [vmem:[#allocation2 + $0x20] ss:$8 sps:$4 sm:$0xff]   ;;  %vm463_vm7 = vcmask 523264   ;;  %s1851_s14 = smul.u32 120, %s2573_s13 }
  0x31   : > { %v2199_v17 = vld [vmem:[#allocation2 + $0x60] ss:$8 sps:$4 sm:$0xff]   ;;  %v291_v33 = vsub.s32 0, %v290_v32  ;;  %v295_v35 = vsub.s32 1, %v290_v32  ;;  %v190_v32 = vld [vmem:[%s2175_s6 + $0x18] sm:$0xff] }
  0x32   : > { %470 = vmatpush1.bf16.msra.mxu1 %v2187_v8  ;;  %345 = vmatpush1.bf16.msra.mxu0 %v1902_v12  ;;  %v287_v34 = vld [vmem:[%s2563_s2] ss:$8 sm:$0x3]  ;;  %s2508_s19 = scalar_lea.vmem %s2564_s3, %s1851_s14 }
  0x33   : > { %471 = vmatprep.subr.bf16.mxu1 %v2189_v10  ;;  %346 = vmatprep.subr.bf16.mxu0 %v1905_v15  ;;  %v2237_v36 = vrot.slane %v287_v34, %v291_v33  ;;  %v2239_v37 = vrot.slane %v287_v34, %v295_v35 }
  0x34   : > { %233 = vperm.xlu1 %1878, %v188_v3   ;;  %201 = vperm.xlu0 %1877, %v188_v3  }
  0x36   : > { %472 = vmatpush1.bf16.msra.mxu1 %v2193_v13  ;;  %347 = vmatpush1.bf16.msra.mxu0 %v1908_v16 }
  0x37   : > { %473 = vmatprep.subr.bf16.mxu1 %v2196_v14  ;;  %621 = vmatprep.subr.bf16.mxu0 %v2179_v4 }
  0x38   : > { %1879 = vset.pattern.permute.xlu1 %v2095_v1 }
  0x3a   : > { %474 = vmatpush1.bf16.msra.mxu1 %v2199_v17 }
  0x3b   : > { %544 = vmatprep.subr.bf16.mxu1 %v2179_v4 }
  0x3d   : > { %500 = vmatmul.mubr.bf16.vlgmr.msra.gmra.mrb[0].mxu1 %v2095_v1 }
  0x3e   : > { %545 = vmatpush1.bf16.msra.mxu1 %v2181_v5  ;;  %576 = vmatprep.mubr.bf16.mxu1 %v2095_v1 }
  0x3f   : > { %546 = vmatprep.subr.bf16.mxu1 %v2183_v6 }
  0x42   : > { %547 = vmatpush1.bf16.msra.mxu1 %v2187_v8 }
  0x43   : > { %548 = vmatprep.subr.bf16.mxu1 %v2189_v10 }
  0x46   : > { %549 = vmatpush1.bf16.msra.mxu1 %v2193_v13 }
  0x47   : > { %550 = vmatprep.subr.bf16.mxu1 %v2196_v14 }
  0x4a   : > { %551 = vmatpush1.bf16.msra.mxu1 %v2199_v17 }
  0x4b   : > { %698 = vmatprep.subr.bf16.mxu1 %v2179_v4 }
  0xaf   : > { %v231_v20 = vpop.permute.xlu1 %230  ;;  %v199_v21 = vpop.permute.xlu0 %198 }
  0xb0   : > { %vm253_vm0 = vcmp.eq.s32.totalorder %v2216_v19, %v231_v20  ;;  %vm221_vm1 = vcmp.eq.s32.totalorder %v2216_v19, %v199_v21  ;;  %v189_v20 = vld [vmem:[%s2175_s6 + $0x10] sm:$0xff]  ;;  %v191_v21 = vld [vmem:[%s2175_s6 + $0x20] sm:$0xff] }
  0xb1   : > { %vm261_vm2 = vmor %vm221_vm1, %vm253_vm0 }
  0xb2   : > { %v269_v25 = vsel %vm261_vm2, 1.0, %v2096_v24 }
  0xb3   : > { %v234_v22 = vpop.permute.xlu1 %233  ;;  %v202_v23 = vpop.permute.xlu0 %201 }
  0xb4   : > { %vm254_vm3 = vcmp.eq.s32.totalorder %v2216_v19, %v234_v22  ;;  %vm222_vm4 = vcmp.eq.s32.totalorder %v2216_v19, %v202_v23  ;;  %v192_v22 = vld [vmem:[%s2175_s6 + $0x28] sm:$0xff]  ;;  %v194_v23 = vld [vmem:[%s2175_s6 + $0x38] sm:$0xff] }
  0xb5   : > { %vm262_vm5 = vmor %vm222_vm4, %vm254_vm3 }
  0xb6   : > { %v270_v26 = vsel %vm262_vm5, 1.0, %v2096_v24 }
  0xb7   : > { %v277_v27 = vpack.c.bf16 %v270_v26, %v269_v25  ;;  %v193_v25 = vld [vmem:[%s2175_s6 + $0x30] sm:$0xff] }
  0xb9   : > { %1685 = vmatmul.mubr.msk.bf16.vlgmr.msra.gmra.mrb[0].mxu0 %vm329_vm6, %v277_v27 }
  0xba   : > { %384 = vmatprep.mubr.bf16.mxu0 %v2095_v1  ;;  %622 = vmatpush1.bf16.msra.mxu0 %v2181_v5 }
  0xbb   : > { %623 = vmatprep.subr.bf16.mxu0 %v2183_v6 }
  0xbe   : > { %624 = vmatpush1.bf16.msra.mxu0 %v2187_v8 }
  0xbf   : > { %625 = vmatprep.subr.bf16.mxu0 %v2189_v10 }
  0xc2   : > { %626 = vmatpush1.bf16.msra.mxu0 %v2193_v13 }
  0xc3   : > { %627 = vmatprep.subr.bf16.mxu0 %v2196_v14 }
  0xc6   : > { %628 = vmatpush1.bf16.msra.mxu0 %v2199_v17 }
  0xc7   : > { %775 = vmatprep.subr.bf16.mxu0 %v2179_v4 }
 0x110   : > { %v501_v28 = vpop.f32.mrb[0].mxu1 }
 0x111   : > { %v503_v29 = vpop.f32.mrb[1].mxu1 }
 0x112   : > { %v505_v30 = vpop.f32.mrb[2].mxu1 }
 0x113   : > { %v506_v31 = vpop.f32.mrb[3].mxu1 }
 0x18c   : > { %v376_v38 = vpop.f32.mrb[0].mxu0 }
 0x18d   : > { %v377_v39 = vadd.f32 %v376_v38, %v2237_v36  ;;  %v378_v40 = vpop.f32.mrb[1].mxu0 }
 0x18e   : > { %v379_v41 = vadd.f32 %v378_v40, %v2239_v37  ;;  %v380_v42 = vpop.f32.mrb[2].mxu0 }
 0x18f   : > { %v508_v43 = vadd.f32 %v501_v28, %v377_v39  ;;  %v382_v44 = vpop.f32.mrb[3].mxu0  ;;  %v381_v2 = vadd.f32 %v380_v42, %v2237_v36 }
 0x190   : > { %v509_v45 = vadd.f32 %v503_v29, %v379_v41  ;;  %v383_v3 = vadd.f32 %v382_v44, %v2239_v37 }
 0x191   : > { %v1697_v47 = vmul.f32 -1.442695, %v508_v43 }
 0x192   : > { %1923 = vtanh.f32 %v509_v45  ;;  %v1698_v57 = vmul.f32 -1.442695, %v509_v45 }
 0x193   : > { %1925 = vpow2.f32 %v1697_v47 }
 0x19c   : > { %v1924_v46 = vpop.eup %1923 }
 0x19d   : > { %525 = vrot.lane.b32.xlu0 %v1924_v46, %s2097_s9  ;;  %v1926_v48 = vpop.eup %1925 }
 0x19e   : > { %v516_v49 = vadd.f32 1.0, %v1926_v48 }
 0x1a0   : > { %1927 = vrcp.f32 %v516_v49 }
 0x1aa   : > { %v1928_v50 = vpop.eup %1927 }
 0x1ab   : > { %v523_v53 = vmul.f32 0.0, %v1928_v50 }
 0x20f   : > { %v526_v51 = vpop.permute.xlu0 %525 }
 0x210   : > { %v528_v52 = vmul.f32 %v1928_v50, %v526_v51 }
 0x212   : > { %530 = vrot.lane.b32.xlu1 %v528_v52, %s2097_s9 }
 0x284   : > { %v531_v54 = vpop.permute.xlu1 %530 }
 0x285   : > { %v2245_v55 = vadd.f32 %v531_v54, %v523_v53 }
 0x287   : > { %1929 = vtanh.f32 %v2245_v55 }
 0x288   : > { %1931 = vpow2.f32 %v1698_v57 }
 0x291   : > { %v1930_v56 = vpop.eup %1929 }
 0x292   : > { %536 = vrot.lane.b32.xlu0 %v1930_v56, %s2097_s9  ;;  %v1932_v58 = vpop.eup %1931 }
 0x293   : > { %v517_v59 = vadd.f32 1.0, %v1932_v58 }
 0x295   : > { %1933 = vrcp.f32 %v517_v59 }
 0x29f   : > { %v1934_v60 = vpop.eup %1933 }
 0x304   : > { %v537_v61 = vpop.permute.xlu0 %536 }
 0x305   : > { %v2249_v62 = vmul.f32 %v1934_v60, %v537_v61 }
 0x307   : > { %v540_v63 = vpack.c.bf16 %v2249_v62, %v2249_v62 }
 0x309   : > { %1699 = vmatmul.mubr.msk.bf16.vlgmr.msra.gmra.mrb[4].mxu1 %vm463_vm7, %v540_v63 }
 0x30a   : > { %699 = vmatpush1.bf16.msra.mxu1 %v2181_v5  ;;  %730 = vmatprep.mubr.bf16.mxu1 %v2095_v1 }
 0x30b   : > { %700 = vmatprep.subr.bf16.mxu1 %v2183_v6 }
 0x30e   : > { %701 = vmatpush1.bf16.msra.mxu1 %v2187_v8 }
 0x30f   : > { %702 = vmatprep.subr.bf16.mxu1 %v2189_v10 }
 0x312   : > { %703 = vmatpush1.bf16.msra.mxu1 %v2193_v13 }
 0x313   : > { %704 = vmatprep.subr.bf16.mxu1 %v2196_v14 }
 0x316   : > { %705 = vmatpush1.bf16.msra.mxu1 %v2199_v17 }
 0x317   : > { %852 = vmatprep.subr.bf16.mxu1 %v2179_v4 }
 0x3dc   : > { %v578_v7 = vpop.f32.mrb[4].mxu1 }
 0x3dd   : > { %v585_v9 = vadd.f32 %v578_v7, %v381_v2  ;;  %v580_v11 = vpop.f32.mrb[5].mxu1 }
 0x3de   : > { %v2265_v12 = vadd.f32 %v580_v11, %v383_v3  ;;  %v582_v15 = vpop.f32.mrb[6].mxu1 }
 0x3df   : > { %v583_v16 = vpop.f32.mrb[7].mxu1  ;;  %v1700_v26 = vmul.f32 -1.442695, %v585_v9 }
 0x3e0   : > { %1935 = vtanh.f32 %v2265_v12  ;;  %v1701_v59 = vmul.f32 -1.442695, %v2265_v12 }
 0x3e1   : > { %1937 = vpow2.f32 %v1700_v26 }
 0x3ea   : > { %v1936_v18 = vpop.eup %1935 }
 0x3eb   : > { %602 = vrot.lane.b32.xlu1 %v1936_v18, %s2097_s9  ;;  %v1938_v27 = vpop.eup %1937 }
 0x3ec   : > { %v593_v28 = vadd.f32 1.0, %v1938_v27 }
 0x3ee   : > { %1939 = vrcp.f32 %v593_v28 }
 0x3ef   : > { %204 = vperm.xlu1 %1879, %v189_v20  }
 0x3f3   : > { %1880 = vset.pattern.permute.xlu1 %v2094_v0 }
 0x3f4   : > { %236 = vperm.xlu1 %1880, %v189_v20  }
 0x3f8   : > { %1882 = vset.pattern.permute.xlu1 %v2095_v1  ;;  %v1940_v29 = vpop.eup %1939 }
 0x3f9   : > { %210 = vperm.xlu1 %1882, %v191_v21   ;;  %v600_v34 = vmul.f32 %v1940_v29, %v2245_v55 }
 0x3fd   : > { %213 = vperm.xlu1 %1882, %v192_v22  }
 0x401   : > { %1883 = vset.pattern.permute.xlu1 %v2094_v0 }
 0x402   : > { %245 = vperm.xlu1 %1883, %v192_v22  }
 0x406   : > { %1885 = vset.pattern.permute.xlu1 %v2095_v1 }
 0x407   : > { %219 = vperm.xlu1 %1885, %v194_v23  }
 0x40b   : > { %1886 = vset.pattern.permute.xlu1 %v2094_v0 }
 0x40c   : > { %248 = vperm.xlu1 %1886, %v193_v25  }
 0x45d   : > { %v603_v30 = vpop.permute.xlu1 %602 }
 0x45e   : > { %v605_v31 = vmul.f32 %v1940_v29, %v603_v30 }
 0x460   : > { %607 = vrot.lane.b32.xlu0 %v605_v31, %s2097_s9 }
 0x464   : > { %207 = vperm.xlu0 %1877, %v190_v32  }
 0x468   : > { %1881 = vset.pattern.permute.xlu0 %v2094_v0 }
 0x469   : > { %239 = vperm.xlu0 %1881, %v190_v32  }
 0x46d   : > { %242 = vperm.xlu0 %1881, %v191_v21  }
 0x46e   : > { %v205_v33 = vpop.permute.xlu1 %204 }
 0x46f   : > { %vm223_vm8 = vcmp.eq.s32.totalorder %v2216_v19, %v205_v33 }
 0x471   : > { %1884 = vset.pattern.permute.xlu0 %v2095_v1 }
 0x472   : > { %216 = vperm.xlu0 %1884, %v193_v25  }
 0x473   : > { %v237_v39 = vpop.permute.xlu1 %236 }
 0x474   : > { %vm255_vm9 = vcmp.eq.s32.totalorder %v2216_v19, %v237_v39 }
 0x475   : > { %vm263_vm10 = vmor %vm223_vm8, %vm255_vm9 }
 0x476   : > { %1887 = vset.pattern.permute.xlu0 %v2094_v0  ;;  %v271_v45 = vsel %vm263_vm10, 1.0, %v2096_v24 }
 0x477   : > { %251 = vperm.xlu0 %1887, %v194_v23  }
 0x478   : > { %v211_v40 = vpop.permute.xlu1 %210 }
 0x479   : > { %vm225_vm0 = vcmp.eq.s32.totalorder %v2216_v19, %v211_v40 }
 0x47c   : > { %v214_v41 = vpop.permute.xlu1 %213 }
 0x47d   : > { %vm226_vm13 = vcmp.eq.s32.totalorder %v2216_v19, %v214_v41 }
 0x481   : > { %v246_v43 = vpop.permute.xlu1 %245 }
 0x482   : > { %vm258_vm14 = vcmp.eq.s32.totalorder %v2216_v19, %v246_v43 }
 0x483   : > { %vm266_vm1 = vmor %vm226_vm13, %vm258_vm14 }
 0x484   : > { %v274_v52 = vsel %vm266_vm1, 1.0, %v2096_v24 }
 0x486   : > { %v220_v46 = vpop.permute.xlu1 %219 }
 0x487   : > { %vm228_vm9 = vcmp.eq.s32.totalorder %v2216_v19, %v220_v46 }
 0x48b   : > { %v249_v50 = vpop.permute.xlu1 %248 }
 0x48c   : > { %vm259_vm4 = vcmp.eq.s32.totalorder %v2216_v19, %v249_v50 }
 0x4d2   : > { %v608_v35 = vpop.permute.xlu0 %607 }
 0x4d3   : > { %v2285_v38 = vadd.f32 %v608_v35, %v600_v34 }
 0x4d5   : > { %1941 = vtanh.f32 %v2285_v38 }
 0x4d6   : > { %1943 = vpow2.f32 %v1701_v59 }
 0x4df   : > { %v1942_v42 = vpop.eup %1941 }
 0x4e0   : > { %613 = vrot.lane.b32.xlu1 %v1942_v42, %s2097_s9  ;;  %v1944_v60 = vpop.eup %1943 }
 0x4e1   : > { %v594_v61 = vadd.f32 1.0, %v1944_v60 }
 0x4e3   : > { %v208_v0 = vpop.permute.xlu0 %207  ;;  %1945 = vrcp.f32 %v594_v61 }
 0x4e4   : > { %vm224_vm11 = vcmp.eq.s32.totalorder %v2216_v19, %v208_v0 }
 0x4e8   : > { %v240_v44 = vpop.permute.xlu0 %239 }
 0x4e9   : > { %vm256_vm12 = vcmp.eq.s32.totalorder %v2216_v19, %v240_v44 }
 0x4ea   : > { %vm264_vm15 = vmor %vm224_vm11, %vm256_vm12 }
 0x4eb   : > { %v272_v47 = vsel %vm264_vm15, 1.0, %v2096_v24 }
 0x4ec   : > { %v278_v48 = vpack.c.bf16 %v272_v47, %v271_v45  ;;  %v243_v49 = vpop.permute.xlu0 %242 }
 0x4ed   : > { %vm257_vm2 = vcmp.eq.s32.totalorder %v2216_v19, %v243_v49  ;;  %v1946_v63 = vpop.eup %1945 }
 0x4ee   : > { %1686 = vmatmul.mubr.msk.bf16.gmra.mrb[4].mxu0 %vm329_vm6, %v278_v48  ;;  %vm265_vm3 = vmor %vm225_vm0, %vm257_vm2 }
 0x4ef   : > { %v273_v51 = vsel %vm265_vm3, 1.0, %v2096_v24  ;;  %394 = vmatprep.mubr.bf16.mxu0 %v2095_v1 }
 0x4f0   : > { %v279_v54 = vpack.c.bf16 %v274_v52, %v273_v51 }
 0x4f1   : > { %v217_v53 = vpop.permute.xlu0 %216 }
 0x4f2   : > { %vm227_vm5 = vcmp.eq.s32.totalorder %v2216_v19, %v217_v53 }
 0x4f3   : > { %vm267_vm8 = vmor %vm227_vm5, %vm259_vm4 }
 0x4f4   : > { %v275_v56 = vsel %vm267_vm8, 1.0, %v2096_v24 }
 0x4f6   : > { %1687 = vmatmul.mubr.msk.bf16.gmra.mrb[8].mxu0 %vm329_vm6, %v279_v54  ;;  %v252_v55 = vpop.permute.xlu0 %251 }
 0x4f7   : > { %vm260_vm10 = vcmp.eq.s32.totalorder %v2216_v19, %v252_v55  ;;  %404 = vmatprep.mubr.bf16.mxu0 %v2095_v1 }
 0x4f8   : > { %vm268_vm11 = vmor %vm228_vm9, %vm260_vm10 }
 0x4f9   : > { %v276_v57 = vsel %vm268_vm11, 1.0, %v2096_v24 }
 0x4fa   : > { %v280_v58 = vpack.c.bf16 %v276_v57, %v275_v56 }
 0x4fe   : > { %1688 = vmatmul.mubr.msk.bf16.gmra.mrb[12].mxu0 %vm329_vm6, %v280_v58  ;;  %vm1079_vm6 = vcmask 261120  }
 0x4ff   : > { %653 = vmatprep.mubr.bf16.mxu0 %v2095_v1 }
 0x552   : > { %v614_v19 = vpop.permute.xlu1 %613 }
 0x553   : > { %v2314_v2 = vmul.f32 %v1946_v63, %v614_v19 }
 0x555   : > { %v617_v3 = vpack.c.bf16 %v2314_v2, %v2314_v2 }
 0x557   : > { %1702 = vmatmul.mubr.msk.bf16.vlgmr.msra.gmra.mrb[16].mxu0 %vm463_vm7, %v617_v3 }
 0x558   : > { %776 = vmatpush1.bf16.msra.mxu0 %v2181_v5  ;;  %807 = vmatprep.mubr.bf16.mxu0 %v2095_v1 }
 0x559   : > { %777 = vmatprep.subr.bf16.mxu0 %v2183_v6 }
 0x55c   : > { %778 = vmatpush1.bf16.msra.mxu0 %v2187_v8 }
 0x55d   : > { %779 = vmatprep.subr.bf16.mxu0 %v2189_v10 }
 0x560   : > { %780 = vmatpush1.bf16.msra.mxu0 %v2193_v13 }
 0x561   : > { %781 = vmatprep.subr.bf16.mxu0 %v2196_v14 }
 0x564   : > { %782 = vmatpush1.bf16.msra.mxu0 %v2199_v17 }
 0x565   : > { %929 = vmatprep.subr.bf16.mxu0 %v2179_v4 }
 0x5c1   : > { %v386_v24 = vpop.f32.mrb[4].mxu0 }
 0x5c2   : > { %v388_v7 = vpop.f32.mrb[5].mxu0  ;;  %v387_v25 = vadd.f32 %v386_v24, %v2237_v36 }
 0x5c3   : > { %v390_v9 = vpop.f32.mrb[6].mxu0  ;;  %v389_v26 = vadd.f32 %v388_v7, %v2239_v37 }
 0x5c4   : > { %v392_v11 = vpop.f32.mrb[7].mxu0 }
 0x5c5   : > { %v393_v53 = vadd.f32 %v392_v11, %v2239_v37 }
 0x5c9   : > { %v2328_v12 = vpop.f32.mrb[8].mxu0 }
 0x5ca   : > { %v2330_v15 = vpop.f32.mrb[9].mxu0 }
 0x5cb   : > { %v2332_v16 = vpop.f32.mrb[10].mxu0 }
 0x5cc   : > { %v2334_v18 = vpop.f32.mrb[11].mxu0 }
 0x5d1   : > { %v2336_v20 = vpop.f32.mrb[12].mxu0 }
 0x5d2   : > { %v2338_v21 = vpop.f32.mrb[13].mxu0 }
 0x5d3   : > { %v2340_v22 = vpop.f32.mrb[14].mxu0 }
 0x5d4   : > { %v2342_v23 = vpop.f32.mrb[15].mxu0 }
 0x62a   : > { %v655_v27 = vpop.f32.mrb[16].mxu0 }
 0x62b   : > { %v662_v28 = vadd.f32 %v655_v27, %v387_v25  ;;  %v657_v29 = vpop.f32.mrb[17].mxu0 }
 0x62c   : > { %v663_v30 = vadd.f32 %v657_v29, %v389_v26  ;;  %v659_v31 = vpop.f32.mrb[18].mxu0 }
 0x62d   : > { %v660_v32 = vpop.f32.mrb[19].mxu0  ;;  %v1703_v34 = vmul.f32 -1.442695, %v662_v28 }
 0x62e   : > { %1947 = vtanh.f32 %v663_v30  ;;  %v1704_v46 = vmul.f32 -1.442695, %v663_v30 }
 0x62f   : > { %1949 = vpow2.f32 %v1703_v34  ;;  %v399_v34 = vadd.f32 %v2330_v15, %v2239_v37 }
 0x638   : > { %v1948_v33 = vpop.eup %1947 }
 0x639   : > { %679 = vrot.lane.b32.xlu1 %v1948_v33, %s2097_s9  ;;  %v1950_v35 = vpop.eup %1949  ;;  %v397_v33 = vadd.f32 %v2328_v12, %v2237_v36 }
 0x63a   : > { %v670_v39 = vadd.f32 1.0, %v1950_v35 }
 0x63c   : > { %1951 = vrcp.f32 %v670_v39 }
 0x646   : > { %v1952_v40 = vpop.eup %1951 }
 0x647   : > { %v677_v0 = vmul.f32 %v1952_v40, %v2285_v38  ;;  %v391_v38 = vadd.f32 %v390_v9, %v2237_v36 }
 0x6ab   : > { %v680_v41 = vpop.permute.xlu1 %679 }
 0x6ac   : > { %v682_v42 = vmul.f32 %v1952_v40, %v680_v41 }
 0x6ae   : > { %684 = vrot.lane.b32.xlu0 %v682_v42, %s2097_s9 }
 0x720   : > { %v685_v43 = vpop.permute.xlu0 %684 }
 0x721   : > { %v687_v44 = vadd.f32 %v685_v43, %v677_v0 }
 0x723   : > { %1953 = vtanh.f32 %v687_v44 }
 0x724   : > { %1955 = vpow2.f32 %v1704_v46 }
 0x72d   : > { %v1954_v45 = vpop.eup %1953 }
 0x72e   : > { %690 = vrot.lane.b32.xlu1 %v1954_v45, %s2097_s9  ;;  %v1956_v47 = vpop.eup %1955 }
 0x72f   : > { %v671_v48 = vadd.f32 1.0, %v1956_v47 }
 0x731   : > { %1957 = vrcp.f32 %v671_v48 }
 0x73b   : > { %v1958_v49 = vpop.eup %1957 }
 0x7a0   : > { %v691_v50 = vpop.permute.xlu1 %690 }
 0x7a1   : > { %v2350_v51 = vmul.f32 %v1958_v49, %v691_v50 }
 0x7a3   : > { %v694_v52 = vpack.c.bf16 %v2350_v51, %v2350_v51 }
 0x7a5   : > { %1705 = vmatmul.mubr.msk.bf16.vlgmr.msra.gmra.mrb[8].mxu1 %vm463_vm7, %v694_v52 }
 0x7a6   : > { %853 = vmatpush1.bf16.msra.mxu1 %v2181_v5  ;;  %884 = vmatprep.mubr.bf16.mxu1 %v2095_v1 }
 0x7a7   : > { %854 = vmatprep.subr.bf16.mxu1 %v2183_v6 }
 0x7aa   : > { %855 = vmatpush1.bf16.msra.mxu1 %v2187_v8 }
 0x7ab   : > { %856 = vmatprep.subr.bf16.mxu1 %v2189_v10 }
 0x7ae   : > { %857 = vmatpush1.bf16.msra.mxu1 %v2193_v13 }
 0x7af   : > { %858 = vmatprep.subr.bf16.mxu1 %v2196_v14 }
 0x7b2   : > { %859 = vmatpush1.bf16.msra.mxu1 %v2199_v17 }
 0x7b3   : > { %1006 = vmatprep.subr.bf16.mxu1 %v2179_v4 }
 0x878   : > { %v732_v54 = vpop.f32.mrb[8].mxu1 }
 0x879   : > { %v739_v55 = vadd.f32 %v732_v54, %v391_v38  ;;  %v734_v56 = vpop.f32.mrb[9].mxu1 }
 0x87a   : > { %v740_v57 = vadd.f32 %v734_v56, %v393_v53  ;;  %v736_v58 = vpop.f32.mrb[10].mxu1 }
 0x87b   : > { %v737_v59 = vpop.f32.mrb[11].mxu1  ;;  %v1706_v61 = vmul.f32 -1.442695, %v739_v55 }
 0x87c   : > { %1959 = vtanh.f32 %v740_v57  ;;  %v1707_v26 = vmul.f32 -1.442695, %v740_v57  ;;  %v401_v59 = vadd.f32 %v2332_v16, %v2237_v36 }
 0x87d   : > { %1961 = vpow2.f32 %v1706_v61 }
 0x886   : > { %v1960_v60 = vpop.eup %1959 }
 0x887   : > { %756 = vrot.lane.b32.xlu0 %v1960_v60, %s2097_s9  ;;  %v1962_v63 = vpop.eup %1961 }
 0x888   : > { %v747_v19 = vadd.f32 1.0, %v1962_v63 }
 0x88a   : > { %1963 = vrcp.f32 %v747_v19 }
 0x894   : > { %v1964_v4 = vpop.eup %1963 }
 0x895   : > { %v754_v7 = vmul.f32 %v1964_v4, %v687_v44 }
 0x8f9   : > { %v757_v3 = vpop.permute.xlu0 %756 }
 0x8fa   : > { %v759_v24 = vmul.f32 %v1964_v4, %v757_v3 }
 0x8fc   : > { %761 = vrot.lane.b32.xlu1 %v759_v24, %s2097_s9 }
 0x96e   : > { %v762_v9 = vpop.permute.xlu1 %761 }
 0x96f   : > { %v764_v11 = vadd.f32 %v762_v9, %v754_v7 }
 0x971   : > { %1965 = vtanh.f32 %v764_v11 }
 0x972   : > { %1967 = vpow2.f32 %v1707_v26 }
 0x97b   : > { %v1966_v25 = vpop.eup %1965 }
 0x97c   : > { %767 = vrot.lane.b32.xlu0 %v1966_v25, %s2097_s9  ;;  %v1968_v27 = vpop.eup %1967 }
 0x97d   : > { %v748_v28 = vadd.f32 1.0, %v1968_v27 }
 0x97f   : > { %1969 = vrcp.f32 %v748_v28 }
 0x989   : > { %v1970_v29 = vpop.eup %1969 }
 0x9ee   : > { %v768_v30 = vpop.permute.xlu0 %767 }
 0x9ef   : > { %v2369_v31 = vmul.f32 %v1970_v29, %v768_v30 }
 0x9f1   : > { %v771_v32 = vpack.c.bf16 %v2369_v31, %v2369_v31 }
 0x9f3   : > { %1708 = vmatmul.mubr.msk.bf16.vlgmr.msra.gmra.mrb[20].mxu0 %vm463_vm7, %v771_v32 }
 0x9f4   : > { %930 = vmatpush1.bf16.msra.mxu0 %v2181_v5  ;;  %961 = vmatprep.mubr.bf16.mxu0 %v2095_v1 }
 0x9f5   : > { %931 = vmatprep.subr.bf16.mxu0 %v2183_v6 }
 0x9f8   : > { %932 = vmatpush1.bf16.msra.mxu0 %v2187_v8 }
 0x9f9   : > { %933 = vmatprep.subr.bf16.mxu0 %v2189_v10 }
 0x9fc   : > { %934 = vmatpush1.bf16.msra.mxu0 %v2193_v13 }
 0x9fd   : > { %935 = vmatprep.subr.bf16.mxu0 %v2196_v14 }
 0xa00   : > { %936 = vmatpush1.bf16.msra.mxu0 %v2199_v17 }
 0xac6   : > { %v809_v35 = vpop.f32.mrb[20].mxu0 }
 0xac7   : > { %v816_v39 = vadd.f32 %v809_v35, %v397_v33  ;;  %v811_v40 = vpop.f32.mrb[21].mxu0 }
 0xac8   : > { %v817_v41 = vadd.f32 %v811_v40, %v399_v34  ;;  %v813_v42 = vpop.f32.mrb[22].mxu0 }
 0xac9   : > { %v814_v0 = vpop.f32.mrb[23].mxu0  ;;  %v1709_v44 = vmul.f32 -1.442695, %v816_v39 }
 0xaca   : > { %1971 = vtanh.f32 %v817_v41  ;;  %v1710_v38 = vmul.f32 -1.442695, %v817_v41  ;;  %v407_v0 = vadd.f32 %v2336_v20, %v2237_v36 }
 0xacb   : > { %1973 = vpow2.f32 %v1709_v44 }
 0xad4   : > { %v1972_v43 = vpop.eup %1971 }
 0xad5   : > { %833 = vrot.lane.b32.xlu1 %v1972_v43, %s2097_s9  ;;  %v1974_v45 = vpop.eup %1973  ;;  %v409_v43 = vadd.f32 %v2338_v21, %v2239_v37  ;;  %v1909_v21 = vld [vmem:[#allocation2 + $0x70] ss:$8 sps:$4 sm:$0xff]  }
 0xad6   : > { %v824_v46 = vadd.f32 1.0, %v1974_v45  ;;  %1791 = vmatprep.subr.bf16.mxu0 %v1909_v21 }
 0xad8   : > { %1975 = vrcp.f32 %v824_v46 }
 0xae2   : > { %v1976_v47 = vpop.eup %1975 }
 0xae3   : > { %v831_v15 = vmul.f32 %v1976_v47, %v764_v11 }
 0xb47   : > { %v834_v12 = vpop.permute.xlu1 %833 }
 0xb48   : > { %v836_v48 = vmul.f32 %v1976_v47, %v834_v12 }
 0xb4a   : > { %838 = vrot.lane.b32.xlu0 %v836_v48, %s2097_s9 }
 0xbbc   : > { %v839_v49 = vpop.permute.xlu0 %838 }
 0xbbd   : > { %v841_v50 = vadd.f32 %v839_v49, %v831_v15 }
 0xbbf   : > { %1977 = vtanh.f32 %v841_v50 }
 0xbc0   : > { %1979 = vpow2.f32 %v1710_v38 }
 0xbc9   : > { %v1978_v52 = vpop.eup %1977 }
 0xbca   : > { %844 = vrot.lane.b32.xlu1 %v1978_v52, %s2097_s9  ;;  %v1980_v53 = vpop.eup %1979 }
 0xbcb   : > { %v825_v54 = vadd.f32 1.0, %v1980_v53 }
 0xbcd   : > { %1981 = vrcp.f32 %v825_v54  ;;  %v1910_v54 = vld [vmem:[#allocation2 + $0x80] ss:$8 sps:$4 sm:$0xff]  }
 0xbd7   : > { %v1982_v55 = vpop.eup %1981 }
 0xc3c   : > { %v845_v56 = vpop.permute.xlu1 %844 }
 0xc3d   : > { %v2389_v57 = vmul.f32 %v1982_v55, %v845_v56  ;;  %v1911_v55 = vld [vmem:[#allocation2 + $0x90] ss:$8 sps:$4 sm:$0xff]  }
 0xc3f   : > { %v848_v58 = vpack.c.bf16 %v2389_v57, %v2389_v57  ;;  %v2414_v29 = vsel %vm1079_vm6, %v2369_v31, %v2389_v57  ;;  %v2426_v33 = vsel %vm1079_vm6, %v2389_v57, %v2350_v51  ;;  %v2440_v40 = vsel %vm1079_vm6, %v2389_v57, %v2369_v31 }
 0xc41   : > { %1711 = vmatmul.mubr.msk.bf16.vlgmr.msra.gmra.mrb[12].mxu1 %vm463_vm7, %v848_v58 }
 0xc42   : > { %1007 = vmatpush1.bf16.msra.mxu1 %v2181_v5  ;;  %1038 = vmatprep.mubr.bf16.mxu1 %v2095_v1  ;;  %v403_v5 = vadd.f32 %v2334_v18, %v2239_v37 }
 0xc43   : > { %1008 = vmatprep.subr.bf16.mxu1 %v2183_v6 }
 0xc46   : > { %1009 = vmatpush1.bf16.msra.mxu1 %v2187_v8 }
 0xc47   : > { %1010 = vmatprep.subr.bf16.mxu1 %v2189_v10 }
 0xc4a   : > { %1011 = vmatpush1.bf16.msra.mxu1 %v2193_v13 }
 0xc4b   : > { %1012 = vmatprep.subr.bf16.mxu1 %v2196_v14 }
 0xc4e   : > { %1013 = vmatpush1.bf16.msra.mxu1 %v2199_v17 }
 0xd14   : > { %v886_v60 = vpop.f32.mrb[12].mxu1 }
 0xd15   : > { %v893_v1 = vadd.f32 %v886_v60, %v401_v59  ;;  %v888_v61 = vpop.f32.mrb[13].mxu1 }
 0xd16   : > { %v894_v6 = vadd.f32 %v888_v61, %v403_v5  ;;  %v890_v63 = vpop.f32.mrb[14].mxu1  ;;  %v1912_v5 = vld [vmem:[#allocation2 + $0xa0] ss:$8 sps:$4 sm:$0xff]  }
 0xd17   : > { %v891_v8 = vpop.f32.mrb[15].mxu1  ;;  %v1712_v13 = vmul.f32 -1.442695, %v893_v1  ;;  %v1913_v1 = vld [vmem:[#allocation2 + $0xb0] ss:$8 sps:$4 sm:$0xff]  }
 0xd18   : > { %1983 = vtanh.f32 %v894_v6  ;;  %v1713_v9 = vmul.f32 -1.442695, %v894_v6  ;;  %1807 = vmatprep.subr.bf16.mxu1 %v1913_v1 }
 0xd19   : > { %1985 = vpow2.f32 %v1712_v13 }
 0xd22   : > { %v1984_v10 = vpop.eup %1983 }
 0xd23   : > { %910 = vrot.lane.b32.xlu0 %v1984_v10, %s2097_s9  ;;  %v1986_v14 = vpop.eup %1985 }
 0xd24   : > { %v901_v17 = vadd.f32 1.0, %v1986_v14  ;;  %v1082_v14 = vsel %vm1079_vm6, %v2350_v51, %v2389_v57 }
 0xd26   : > { %1987 = vrcp.f32 %v901_v17 }
 0xd30   : > { %v1988_v19 = vpop.eup %1987 }
 0xd31   : > { %v908_v18 = vmul.f32 %v1988_v19, %v841_v50 }
 0xd95   : > { %v911_v16 = vpop.permute.xlu0 %910 }
 0xd96   : > { %v913_v4 = vmul.f32 %v1988_v19, %v911_v16 }
 0xd98   : > { %915 = vrot.lane.b32.xlu1 %v913_v4, %s2097_s9 }
 0xe0a   : > { %v916_v3 = vpop.permute.xlu1 %915 }
 0xe0b   : > { %v918_v24 = vadd.f32 %v916_v3, %v908_v18  ;;  %v1095_v18 = vpack.c.bf16 %v2369_v31, %v1082_v14  ;;  %v1914_v3 = vld [vmem:[#allocation2 + $0xc0] ss:$8 sps:$4 sm:$0xff]   ;;  %v1915_v31 = vld [vmem:[#allocation2 + $0xd0] ss:$8 sps:$4 sm:$0xff]  }
 0xe0c   : > { %v1918_v14 = vld [vmem:[#allocation2 + $0x100] ss:$8 sps:$4 sm:$0xff]  }
 0xe0d   : > { %1989 = vtanh.f32 %v918_v24 }
 0xe0e   : > { %1991 = vpow2.f32 %v1713_v9  ;;  %v413_v9 = vadd.f32 %v2342_v23, %v2239_v37 }
 0xe17   : > { %v1990_v7 = vpop.eup %1989 }
 0xe18   : > { %921 = vrot.lane.b32.xlu0 %v1990_v7, %s2097_s9  ;;  %v1992_v11 = vpop.eup %1991  ;;  %v411_v7 = vadd.f32 %v2340_v22, %v2237_v36 }
 0xe19   : > { %v902_v25 = vadd.f32 1.0, %v1992_v11 }
 0xe1b   : > { %1993 = vrcp.f32 %v902_v25  ;;  %v1098_v25 = vld [vmem:[%s2563_s2 + $0x1] ss:$0 sm:$0xff] }
 0xe25   : > { %v1994_v26 = vpop.eup %1993 }
 0xe8a   : > { %v922_v27 = vpop.permute.xlu0 %921 }
 0xe8b   : > { %v2409_v28 = vmul.f32 %v1994_v26, %v922_v27 }
 0xe8d   : > { %v2419_v30 = vsel %vm1079_vm6, %v2350_v51, %v2409_v28  ;;  %v925_v32 = vpack.c.bf16 %v2409_v28, %v2409_v28  ;;  %v2431_v34 = vsel %vm1079_vm6, %v2409_v28, %v2314_v2  ;;  %v2445_v41 = vsel %vm1079_vm6, %v2409_v28, %v2350_v51 }
 0xe8e   : > { %v1336_v35 = vpack.c.bf16 %v2414_v29, %v2419_v30  ;;  %v1096_v39 = vpack.c.bf16 %v2431_v34, %v2426_v33  ;;  %v1337_v42 = vpack.c.bf16 %v2445_v41, %v2440_v40  ;;  %v1081_v16 = vsel %vm1079_vm6, %v2314_v2, %v2409_v28 }
 0xe8f   : > { %1714 = vmatmul.mubr.msk.bf16.vlgmr.msra.gmra.mrb[24].mxu0 %vm463_vm7, %v925_v32 }
 0xe90   : > { %1792 = vmatpush3.bf16.msra.mxu0 %v1909_v21 }
 0xe91   : > { %1793 = vmatprep.subr.bf16.mxu0 %v1910_v54 }
 0xe94   : > { %1794 = vmatpush3.bf16.msra.mxu0 %v1910_v54 }
 0xe95   : > { %1795 = vmatprep.subr.bf16.mxu0 %v1911_v55 }
 0xe98   : > { %1796 = vmatpush3.bf16.msra.mxu0 %v1911_v55 }
 0xe99   : > { %1797 = vmatprep.subr.bf16.mxu0 %v1912_v5 }
 0xe9c   : > { %1798 = vmatpush3.bf16.msra.mxu0 %v1912_v5 }
 0xf62   : > { %v963_v44 = vpop.f32.mrb[24].mxu0 }
 0xf63   : > { %v970_v45 = vadd.f32 %v963_v44, %v407_v0  ;;  %v965_v46 = vpop.f32.mrb[25].mxu0 }
 0xf64   : > { %v971_v47 = vadd.f32 %v965_v46, %v409_v43  ;;  %v967_v12 = vpop.f32.mrb[26].mxu0 }
 0xf65   : > { %v968_v48 = vpop.f32.mrb[27].mxu0  ;;  %v1715_v49 = vmul.f32 -1.442695, %v970_v45 }
 0xf66   : > { %1995 = vtanh.f32 %v971_v47  ;;  %v1716_v61 = vmul.f32 -1.442695, %v971_v47 }
 0xf67   : > { %1997 = vpow2.f32 %v1715_v49 }
 0xf70   : > { %v1996_v15 = vpop.eup %1995 }
 0xf71   : > { %987 = vrot.lane.b32.xlu1 %v1996_v15, %s2097_s9  ;;  %v1998_v50 = vpop.eup %1997 }
 0xf72   : > { %v978_v52 = vadd.f32 1.0, %v1998_v50 }
 0xf74   : > { %1999 = vrcp.f32 %v978_v52 }
 0xf7e   : > { %v2000_v38 = vpop.eup %1999 }
 0xf7f   : > { %v985_v56 = vmul.f32 %v2000_v38, %v918_v24  ;;  %v1916_v24 = vld [vmem:[#allocation2 + $0xe0] ss:$8 sps:$4 sm:$0xff]  }
 0xfe3   : > { %v988_v20 = vpop.permute.xlu1 %987 }
 0xfe4   : > { %v990_v53 = vmul.f32 %v2000_v38, %v988_v20 }
 0xfe6   : > { %992 = vrot.lane.b32.xlu0 %v990_v53, %s2097_s9 }
0x1058   : > { %v993_v58 = vpop.permute.xlu0 %992 }
0x1059   : > { %v2456_v59 = vadd.f32 %v993_v58, %v985_v56 }
0x105b   : > { %2001 = vtanh.f32 %v2456_v59 }
0x105c   : > { %2003 = vpow2.f32 %v1716_v61 }
0x1065   : > { %v2002_v60 = vpop.eup %2001 }
0x1066   : > { %998 = vrot.lane.b32.xlu1 %v2002_v60, %s2097_s9  ;;  %v2004_v6 = vpop.eup %2003 }
0x1067   : > { %v979_v63 = vadd.f32 1.0, %v2004_v6 }
0x1069   : > { %2005 = vrcp.f32 %v979_v63 }
0x1073   : > { %v2006_v8 = vpop.eup %2005 }
0x10d8   : > { %v999_v10 = vpop.permute.xlu1 %998 }
0x10d9   : > { %v2460_v13 = vmul.f32 %v2006_v8, %v999_v10  ;;  %v1917_v10 = vld [vmem:[#allocation2 + $0xf0] ss:$8 sps:$4 sm:$0xff]  }
0x10da   : > { %1823 = vmatprep.subr.bf16.mxu0 %v1917_v10 }
0x10db   : > { %v1002_v17 = vpack.c.bf16 %v2460_v13, %v2460_v13  ;;  %v1080_v19 = vsel %vm1079_vm6, %v2249_v62, %v2460_v13  ;;  %v1085_v51 = vsel %vm1079_vm6, %v2460_v13, %v2249_v62 }
0x10dc   : > { %v1094_v4 = vpack.c.bf16 %v1081_v16, %v1080_v19  ;;  %v1097_v57 = vpack.c.bf16 %v1085_v51, %v1085_v51  ;;  %v1218_v19 = vld [vmem:[%s2563_s2 + $0x2] ss:$0 sm:$0xff] }
0x10dd   : > { %1717 = vmatmul.mubr.msk.bf16.vlgmr.msra.gmra.mrb[16].mxu1 %vm463_vm7, %v1002_v17  ;;  %v1919_v17 = vld [vmem:[#allocation2 + $0x110] ss:$8 sps:$4 sm:$0xff]  }
0x10de   : > { %1799 = vmatprep.mubr.msk.bf16.mxu0 %vm463_vm7, %v1094_v4  ;;  %1808 = vmatpush3.bf16.msra.mxu1 %v1913_v1 }
0x10df   : > { %1800 = vmatmul.mubr.msk.bf16.vlgmr.msra.gmra.mrb[28].mxu0 %vm463_vm7, %v1095_v18  ;;  %1809 = vmatprep.subr.bf16.mxu1 %v1914_v3 }
0x10e0   : > { %1803 = vmatprep.mubr.msk.bf16.mxu0 %vm463_vm7, %v1096_v39  ;;  %1824 = vmatpush3.bf16.msra.mxu0 %v1917_v10 }
0x10e1   : > { %1825 = vmatprep.subr.bf16.mxu0 %v1918_v14 }
0x10e2   : > { %1810 = vmatpush3.bf16.msra.mxu1 %v1914_v3 }
0x10e3   : > { %1811 = vmatprep.subr.bf16.mxu1 %v1915_v31 }
0x10e4   : > { %1826 = vmatpush3.bf16.msra.mxu0 %v1918_v14 }
0x10e5   : > { %1827 = vmatprep.subr.bf16.mxu0 %v1919_v17 }
0x10e6   : > { %1812 = vmatpush3.bf16.msra.mxu1 %v1915_v31 }
0x10e7   : > { %1804 = vmatmul.mubr.msk.bf16.gmra.mrb[32].mxu0 %vm463_vm7, %v1097_v57  ;;  %1813 = vmatprep.subr.bf16.mxu1 %v1916_v24 }
0x10e8   : > { %1828 = vmatpush3.bf16.msra.mxu0 %v1919_v17 }
0x10ea   : > { %1814 = vmatpush3.bf16.msra.mxu1 %v1916_v24 }
0x11b0   : > { %v1040_v11 = vpop.f32.mrb[16].mxu1 }
0x11b1   : > { %v1047_v26 = vadd.f32 %v1040_v11, %v411_v7  ;;  %v1042_v27 = vpop.f32.mrb[17].mxu1 }
0x11b2   : > { %v2492_v28 = vadd.f32 %v1042_v27, %v413_v9  ;;  %v1044_v32 = vpop.f32.mrb[18].mxu1  ;;  %v1801_v33 = vpop.f32.mrb[28].mxu0 }
0x11b3   : > { %v1178_v34 = vadd.f32 %v1801_v33, %v1098_v25  ;;  %v1045_v39 = vpop.f32.mrb[19].mxu1  ;;  %v1169_v0 = vpop.f32.mrb[29].mxu0  ;;  %v1718_v60 = vmul.f32 -1.442695, %v1047_v26 }
0x11b4   : > { %2007 = vtanh.f32 %v2492_v28  ;;  %v1170_v36 = vadd.f32 %v1169_v0, %v1098_v25  ;;  %v1802_v22 = vpop.f32.mrb[30].mxu0  ;;  %v1920_v0 = vld [vmem:[#allocation2 + $0x120] ss:$8 sps:$4 sm:$0xff]  }
0x11b5   : > { %v1181_v43 = vadd.f32 %v1802_v22, %v1098_v25  ;;  %v1172_v37 = vpop.f32.mrb[31].mxu0  ;;  %v1201_v44 = vmax.f32 %v1178_v34, 0.0  ;;  %2009 = vpow2.f32 %v1718_v60  ;;  %1829 = vmatprep.subr.bf16.mxu0 %v1920_v0  ;;  %v1719_v22 = vmul.f32 -1.442695, %v2492_v28 }
0x11b6   : > { %v1173_v23 = vadd.f32 %v1172_v37, %v1098_v25  ;;  %v1199_v46 = vmax.f32 %v1170_v36, 0.0  ;;  %1830 = vmatpush3.bf16.msra.mxu0 %v1920_v0 }
0x11b7   : > { %v1202_v45 = vmax.f32 %v1181_v43, 0.0 }
0x11b8   : > { %v1200_v47 = vmax.f32 %v1173_v23, 0.0 }
0x11b9   : > { %v1215_v12 = vpack.c.bf16 %v1202_v45, %v1201_v44 }
0x11ba   : > { %v1214_v48 = vpack.c.bf16 %v1200_v47, %v1199_v46  ;;  %v1805_v15 = vpop.f32.mrb[32].mxu0  ;;  %v1325_v46 = vsel %vm1079_vm6, %v2460_v13, %v2314_v2 }
0x11bb   : > { %v1194_v49 = vadd.f32 %v1805_v15, %v1098_v25  ;;  %v1185_v50 = vpop.f32.mrb[33].mxu0 }
0x11bc   : > { %v1186_v52 = vadd.f32 %v1185_v50, %v1098_v25  ;;  %v1806_v38 = vpop.f32.mrb[34].mxu0  ;;  %1815 = vmatprep.mubr.msk.bf16.mxu1 %vm463_vm7, %v1214_v48 }
0x11bd   : > { %v1188_v20 = vpop.f32.mrb[35].mxu0  ;;  %1816 = vmatmul.mubr.msk.bf16.vlgmr.msra.gmra.mrb[20].mxu1 %vm463_vm7, %v1215_v12  ;;  %v1205_v54 = vmax.f32 %v1194_v49, 0.0 }
0x11be   : > { %v2008_v53 = vpop.eup %2007  ;;  %v1189_v21 = vadd.f32 %v1188_v20, %v1098_v25  ;;  %v1203_v55 = vmax.f32 %v1186_v52, 0.0 }
0x11bf   : > { %1064 = vrot.lane.b32.xlu0 %v2008_v53, %s2097_s9  ;;  %v1217_v5 = vpack.c.bf16 %v1205_v54, %v1205_v54  ;;  %v2010_v1 = vpop.eup %2009 }
0x11c0   : > { %v1204_v56 = vmax.f32 %v1189_v21, 0.0  ;;  %v1055_v61 = vadd.f32 1.0, %v2010_v1 }
0x11c2   : > { %v1216_v58 = vpack.c.bf16 %v1204_v56, %v1203_v55  ;;  %2011 = vrcp.f32 %v1055_v61 }
0x11c4   : > { %1819 = vmatprep.mubr.msk.bf16.mxu1 %vm463_vm7, %v1216_v58 }
0x11c5   : > { %1820 = vmatmul.mubr.msk.bf16.gmra.mrb[24].mxu1 %vm463_vm7, %v1217_v5 }
0x11cc   : > { %v2012_v6 = vpop.eup %2011 }
0x11cd   : > { %v1062_v33 = vmul.f32 %v2012_v6, %v2456_v59  ;;  %v1320_v59 = vsel %vm1079_vm6, %v2314_v2, %v2460_v13  ;;  %v1921_v2 = vld [vmem:[#allocation2 + $0x130] ss:$8 sps:$4 sm:$0xff]   ;;  %v1339_v13 = vld [vmem:[%s2563_s2 + $0x3] ss:$0 sm:$0xff] }
0x11ce   : > { %1839 = vmatprep.subr.bf16.mxu1 %v1921_v2 }
0x11cf   : > { %1840 = vmatpush3.bf16.msra.mxu1 %v1921_v2 }
0x1231   : > { %v1065_v63 = vpop.permute.xlu0 %1064 }
0x1232   : > { %v1067_v8 = vmul.f32 %v2012_v6, %v1065_v63 }
0x1234   : > { %1069 = vrot.lane.b32.xlu1 %v1067_v8, %s2097_s9 }
0x1290   : > { %v1817_v16 = vpop.f32.mrb[20].mxu1 }
0x1291   : > { %v1298_v4 = vadd.f32 %v1817_v16, %v1218_v19  ;;  %v1289_v18 = vpop.f32.mrb[21].mxu1 }
0x1292   : > { %v1290_v51 = vadd.f32 %v1289_v18, %v1218_v19  ;;  %v1818_v57 = vpop.f32.mrb[22].mxu1 }
0x1293   : > { %1589 = vst [vmem:[%s2508_s19 + $0x10] sm:$0xff] %v1298_v4  ;;  %v1301_v3 = vadd.f32 %v1818_v57, %v1218_v19  ;;  %v1292_v31 = vpop.f32.mrb[23].mxu1 }
0x1294   : > { %1587 = vst [vmem:[%s2508_s19] sm:$0xff] %v1290_v51  ;;  %v1293_v24 = vadd.f32 %v1292_v31, %v1218_v19 }
0x1295   : > { %1590 = vst [vmem:[%s2508_s19 + $0x18] sm:$0xff] %v1301_v3 }
0x1296   : > { %1588 = vst [vmem:[%s2508_s19 + $0x8] sm:$0xff] %v1293_v24 }
0x1298   : > { %v1821_v7 = vpop.f32.mrb[24].mxu1 }
0x1299   : > { %v1314_v9 = vadd.f32 %v1821_v7, %v1218_v19  ;;  %v1305_v11 = vpop.f32.mrb[25].mxu1 }
0x129a   : > { %v1306_v25 = vadd.f32 %v1305_v11, %v1218_v19  ;;  %v1822_v26 = vpop.f32.mrb[26].mxu1 }
0x129b   : > { %1593 = vst [vmem:[%s2508_s19 + $0x30] sm:$0xff] %v1314_v9  ;;  %v1308_v27 = vpop.f32.mrb[27].mxu1 }
0x129c   : > { %1591 = vst [vmem:[%s2508_s19 + $0x20] sm:$0xff] %v1306_v25  ;;  %v1309_v32 = vadd.f32 %v1308_v27, %v1218_v19 }
0x129e   : > { %1592 = vst [vmem:[%s2508_s19 + $0x28] sm:$0xff] %v1309_v32 }
0x12a6   : > { %v1070_v34 = vpop.permute.xlu1 %1069 }
0x12a7   : > { %v1072_v39 = vadd.f32 %v1070_v34, %v1062_v33 }
0x12a9   : > { %2013 = vtanh.f32 %v1072_v39 }
0x12aa   : > { %2015 = vpow2.f32 %v1719_v22 }
0x12b3   : > { %v2014_v36 = vpop.eup %2013 }
0x12b4   : > { %1075 = vrot.lane.b32.xlu0 %v2014_v36, %s2097_s9  ;;  %v2016_v43 = vpop.eup %2015 }
0x12b5   : > { %v1056_v37 = vadd.f32 1.0, %v2016_v43 }
0x12b7   : > { %2017 = vrcp.f32 %v1056_v37 }
0x12c1   : > { %v2018_v23 = vpop.eup %2017 }
0x1326   : > { %v1076_v44 = vpop.permute.xlu0 %1075 }
0x1327   : > { %v1078_v45 = vmul.f32 %v2018_v23, %v1076_v44  ;;  %v1497_v23 = vld [vmem:[%s2563_s2 + $0x4] ss:$0 sm:$0xff] }
0x1329   : > { %v1319_v47 = vsel %vm1079_vm6, %v2249_v62, %v1078_v45  ;;  %v1326_v28 = vsel %vm1079_vm6, %v1078_v45, %v2249_v62  ;;  %v1922_v62 = vld [vmem:[#allocation2 + $0x140] ss:$8 sps:$4 sm:$0xff]  }
0x132a   : > { %v1335_v12 = vpack.c.bf16 %v1320_v59, %v1319_v47  ;;  %v1338_v48 = vpack.c.bf16 %v1326_v28, %v1325_v46  ;;  %1841 = vmatprep.subr.bf16.mxu1 %v1922_v62 }
0x132b   : > { %1842 = vmatpush3.bf16.msra.mxu1 %v1922_v62 }
0x132c   : > { %1831 = vmatprep.mubr.msk.bf16.mxu0 %vm463_vm7, %v1335_v12 }
0x132d   : > { %1832 = vmatmul.mubr.msk.bf16.vlgmr.msra.gmra.mrb[36].mxu0 %vm463_vm7, %v1336_v35 }
0x132e   : > { %1835 = vmatprep.mubr.msk.bf16.mxu0 %vm463_vm7, %v1337_v42 }
0x1335   : > { %1836 = vmatmul.mubr.msk.bf16.gmra.mrb[40].mxu0 %vm463_vm7, %v1338_v48 }
0x1400   : > { %v1833_v29 = vpop.f32.mrb[36].mxu0 }
0x1401   : > { %v1419_v30 = vadd.f32 %v1833_v29, %v1339_v13  ;;  %v1410_v35 = vpop.f32.mrb[37].mxu0 }
0x1402   : > { %v1411_v15 = vadd.f32 %v1410_v35, %v1339_v13  ;;  %v1834_v49 = vpop.f32.mrb[38].mxu0 }
0x1403   : > { %v1746_v40 = vmul.f32 -1.442695, %v1419_v30  ;;  %v1422_v41 = vadd.f32 %v1834_v49, %v1339_v13  ;;  %v1413_v42 = vpop.f32.mrb[39].mxu0 }
0x1404   : > { %v1744_v50 = vmul.f32 -1.442695, %v1411_v15  ;;  %v1414_v52 = vadd.f32 %v1413_v42, %v1339_v13 }
0x1405   : > { %2019 = vpow2.f32 %v1746_v40  ;;  %v1747_v38 = vmul.f32 -1.442695, %v1422_v41 }
0x1406   : > { %2021 = vpow2.f32 %v1744_v50  ;;  %v1745_v20 = vmul.f32 -1.442695, %v1414_v52 }
0x1407   : > { %2023 = vpow2.f32 %v1747_v38 }
0x1408   : > { %2025 = vpow2.f32 %v1745_v20  ;;  %v1837_v53 = vpop.f32.mrb[40].mxu0 }
0x1409   : > { %v1435_v21 = vadd.f32 %v1837_v53, %v1339_v13  ;;  %v1426_v54 = vpop.f32.mrb[41].mxu0 }
0x140a   : > { %v1427_v55 = vadd.f32 %v1426_v54, %v1339_v13  ;;  %v1838_v56 = vpop.f32.mrb[42].mxu0 }
0x140b   : > { %v1750_v58 = vmul.f32 -1.442695, %v1435_v21  ;;  %v1438_v5 = vadd.f32 %v1838_v56, %v1339_v13  ;;  %v1429_v60 = vpop.f32.mrb[43].mxu0 }
0x140c   : > { %v1748_v1 = vmul.f32 -1.442695, %v1427_v55  ;;  %v1430_v61 = vadd.f32 %v1429_v60, %v1339_v13 }
0x140d   : > { %2027 = vpow2.f32 %v1750_v58  ;;  %v1751_v6 = vmul.f32 -1.442695, %v1438_v5 }
0x140e   : > { %2029 = vpow2.f32 %v1748_v1  ;;  %v1749_v63 = vmul.f32 -1.442695, %v1430_v61 }
0x140f   : > { %v2020_v8 = vpop.eup %2019  ;;  %2031 = vpow2.f32 %v1751_v6 }
0x1410   : > { %v2022_v10 = vpop.eup %2021  ;;  %v1467_v14 = vadd.f32 1.0, %v2020_v8  ;;  %2033 = vpow2.f32 %v1749_v63 }
0x1411   : > { %v2024_v17 = vpop.eup %2023  ;;  %v1465_v19 = vadd.f32 1.0, %v2022_v10 }
0x1412   : > { %v2026_v16 = vpop.eup %2025  ;;  %2035 = vrcp.f32 %v1467_v14  ;;  %v1468_v4 = vadd.f32 1.0, %v2024_v17 }
0x1413   : > { %2037 = vrcp.f32 %v1465_v19  ;;  %v1466_v18 = vadd.f32 1.0, %v2026_v16 }
0x1414   : > { %2039 = vrcp.f32 %v1468_v4 }
0x1415   : > { %2041 = vrcp.f32 %v1466_v18 }
0x1417   : > { %v2028_v51 = vpop.eup %2027 }
0x1418   : > { %v2030_v57 = vpop.eup %2029  ;;  %v1471_v3 = vadd.f32 1.0, %v2028_v51 }
0x1419   : > { %v2032_v31 = vpop.eup %2031  ;;  %v1469_v24 = vadd.f32 1.0, %v2030_v57 }
0x141a   : > { %v2034_v7 = vpop.eup %2033  ;;  %2043 = vrcp.f32 %v1471_v3  ;;  %v1472_v9 = vadd.f32 1.0, %v2032_v31 }
0x141b   : > { %2045 = vrcp.f32 %v1469_v24  ;;  %v1470_v11 = vadd.f32 1.0, %v2034_v7 }
0x141c   : > { %v2036_v25 = vpop.eup %2035  ;;  %2047 = vrcp.f32 %v1472_v9 }
0x141d   : > { %v2038_v26 = vpop.eup %2037  ;;  %2049 = vrcp.f32 %v1470_v11 }
0x141e   : > { %v2040_v27 = vpop.eup %2039 }
0x141f   : > { %v2042_v32 = vpop.eup %2041  ;;  %v1494_v33 = vpack.c.bf16 %v2040_v27, %v2036_v25 }
0x1420   : > { %v1493_v34 = vpack.c.bf16 %v2042_v32, %v2038_v26 }
0x1422   : > { %1843 = vmatprep.mubr.msk.bf16.mxu1 %vm1079_vm6, %v1493_v34 }
0x1423   : > { %1844 = vmatmul.mubr.msk.bf16.vlgmr.msra.gmra.mrb[28].mxu1 %vm1079_vm6, %v1494_v33 }
0x1424   : > { %v2044_v39 = vpop.eup %2043 }
0x1425   : > { %v2046_v0 = vpop.eup %2045 }
0x1426   : > { %v2048_v36 = vpop.eup %2047 }
0x1427   : > { %v2050_v22 = vpop.eup %2049  ;;  %v1496_v43 = vpack.c.bf16 %v2048_v36, %v2044_v39 }
0x1428   : > { %v1495_v37 = vpack.c.bf16 %v2050_v22, %v2046_v0 }
0x142a   : > { %1847 = vmatprep.mubr.msk.bf16.mxu1 %vm1079_vm6, %v1495_v37 }
0x142b   : > { %1848 = vmatmul.mubr.msk.bf16.gmra.mrb[32].mxu1 %vm1079_vm6, %v1496_v43 }
0x14f6   : > { %v1845_v44 = vpop.f32.mrb[28].mxu1 }
0x14f7   : > { %v1565_v45 = vadd.f32 %v1845_v44, %v1497_v23  ;;  %v1556_v59 = vpop.f32.mrb[29].mxu1 }
0x14f8   : > { %v1557_v46 = vadd.f32 %v1556_v59, %v1497_v23  ;;  %v1846_v47 = vpop.f32.mrb[30].mxu1 }
0x14f9   : > { %1596 = vst [vmem:[%s2508_s19 + $0x48] sm:$0xff] %v1565_v45  ;;  %v1568_v28 = vadd.f32 %v1846_v47, %v1497_v23  ;;  %v1559_v12 = vpop.f32.mrb[31].mxu1 }
0x14fa   : > { %1594 = vst [vmem:[%s2508_s19 + $0x38] sm:$0xff] %v1557_v46  ;;  %v1560_v48 = vadd.f32 %v1559_v12, %v1497_v23 }
0x14fb   : > { %1597 = vst [vmem:[%s2508_s19 + $0x50] sm:$0xff] %v1568_v28 }
0x14fc   : > { %1595 = vst [vmem:[%s2508_s19 + $0x40] sm:$0xff] %v1560_v48 }
0x14fe   : > { %v1849_v2 = vpop.f32.mrb[32].mxu1 }
0x14ff   : > { %v1581_v62 = vadd.f32 %v1849_v2, %v1497_v23  ;;  %v1572_v13 = vpop.f32.mrb[33].mxu1 }
0x1500   : > { %v1573_v29 = vadd.f32 %v1572_v13, %v1497_v23  ;;  %v1850_v30 = vpop.f32.mrb[34].mxu1 }
0x1501   : > { %1600 = vst [vmem:[%s2508_s19 + $0x68] sm:$0xff] %v1581_v62  ;;  %v1584_v35 = vadd.f32 %v1850_v30, %v1497_v23  ;;  %v1575_v15 = vpop.f32.mrb[35].mxu1 }
0x1502   : > { %1598 = vst [vmem:[%s2508_s19 + $0x58] sm:$0xff] %v1573_v29  ;;  %v1576_v49 = vadd.f32 %v1575_v15, %v1497_v23 }
0x1503   : > { %1601 = vst [vmem:[%s2508_s19 + $0x70] sm:$0xff] %v1584_v35 }
0x1504   : > { %1599 = vst [vmem:[%s2508_s19 + $0x60] sm:$0xff] %v1576_v49 }
0x1505 PF: > { %s14_s12 = sadd.s32 1, %s2089_s12  }
0x1506   : > { %p11_p3 = scmp.ge.s32.totalorder %s14_s12, 4  }
0x1508   :  { %13 = sbr.rel (!%p11_p3) target bundleno = 1 (0x1), region = 67 }
0x150f   :  { %1623 = vsyncpa [#allocation3], 1 }
0x1510   :  { %1625 = vsyncpa [#allocation3 + $0x1], 1 }

</bundles_post_ra>
